<compile_context>
chip_gen: v7x
topology: tpu7x:2x2x1
jax: 0.10.0
libtpu: 0.0.40
codegen_flags: <defaults>
</compile_context>

<pallas_src>
import functools

import jax
import jax.numpy as jnp
from jax import lax
from jax.experimental import pallas as pl
from jax.experimental.pallas import tpu as pltpu


def _round_up(x, m):
    return -(-x // m) * m


def _masked_attention_kernel(x_ref, wqkv_ref, bqkv_ref, out_ref,
                             q_sc, kv_sc, acc_sc, m_sc, l_sc,
                             *, heads_per_group, head_dim, tile, matmul_dtype):
    G, D, t = heads_per_group, head_dim, tile
    GD = G * D
    md = matmul_dtype

    qi = pl.program_id(1)
    ki = pl.program_id(2)

    # ---- online-softmax update for one KV tile (shared by diagonal & interior) ----
    def flash_update(kv, mask_bias):
        q = q_sc[...]                                            # (t, GD) matmul dtype
        for h in range(G):                                       # small static unroll
            lo, hi = h * D, (h + 1) * D
            # Contract q.k on the LAST dim of both operands: no k.T relayout.
            s = lax.dot_general(
                q[:, lo:hi], kv[:, lo:hi],
                dimension_numbers=(((1,), (1,)), ((), ())),
                preferred_element_type=jnp.float32)              # (t, t) f32
            if mask_bias is not None:
                s = s + mask_bias
            m_prev = m_sc[h]                                     # (t, 1)
            m_new = jnp.maximum(m_prev, jnp.max(s, axis=-1, keepdims=True))
            alpha = jnp.exp(m_prev - m_new)
            p = jnp.exp(s - m_new)                               # (t, t) f32 (EUP)
            l_sc[h] = alpha * l_sc[h] + jnp.sum(p, axis=-1, keepdims=True)
            acc_sc[h] = alpha * acc_sc[h] + jnp.dot(
                p.astype(md), kv[:, GD + lo:GD + hi],
                preferred_element_type=jnp.float32)
            m_sc[h] = m_new

    # ---- per-(group, q-tile) init: project Q once, reset online-softmax state ----
    @pl.when(ki == 0)
    def _init():
        x = x_ref[...]                                           # (t, E), matmul dtype
        q = jnp.dot(x, wqkv_ref[0, :, 0:GD],
                    preferred_element_type=jnp.float32) + bqkv_ref[0, :, 0:GD]
        # Fold 1/sqrt(D) into Q (scales t*GD elements, not t*t scores); store in md.
        q_sc[...] = (q * jnp.float32(1.0 / (D ** 0.5))).astype(md)
        acc_sc[...] = jnp.zeros_like(acc_sc)
        m_sc[...] = jnp.full_like(m_sc, -jnp.inf)
        l_sc[...] = jnp.zeros_like(l_sc)

    # ---- interior KV tiles (strictly below the diagonal): cached K/V, no mask ----
    @pl.when(ki < qi)
    def _interior():
        flash_update(kv_sc[ki], None)

    # ---- diagonal tile: project K/V ONCE, fill the cache, masked update, finalize ----
    @pl.when(ki == qi)
    def _diag():
        x = x_ref[...]                                           # same rows as Q tile
        kv = (jnp.dot(x, wqkv_ref[0, :, GD:3 * GD],
                      preferred_element_type=jnp.float32)
              + bqkv_ref[0, :, GD:3 * GD]).astype(md)            # (t, 2GD): [K | V]
        kv_sc[ki] = kv                                           # cache for later q tiles

        rows = lax.broadcasted_iota(jnp.int32, (t, t), 0)
        cols = lax.broadcasted_iota(jnp.int32, (t, t), 1)
        mask_bias = jnp.where(cols > rows, jnp.float32(-1e9), jnp.float32(0.0))
        flash_update(kv, mask_bias)

        # The diagonal is the last processed KV tile of this q row; normalize and
        # store one lane-dense (t, G*D) slab of the final (S, E) layout.  Steps with
        # ki > qi touch nothing; the block is flushed when (qi, g) changes.
        outs = []
        for h in range(G):
            inv_l = pl.reciprocal(l_sc[h], approx=True)          # EUP slot, VALU-free
            outs.append(acc_sc[h] * inv_l)
        out_ref[...] = jnp.concatenate(outs, axis=-1).astype(out_ref.dtype)


def _choose_head_group(num_heads, head_dim, emb_dim):
    """Group heads so the fused projection / output last dim is lane-dense."""
    G = min(num_heads, max(1, 128 // head_dim))
    while num_heads % G:
        G -= 1
    GD = G * head_dim
    if GD % 128 != 0 and GD != emb_dim:
        # Fall back to a single group (full E) so sub-array block shapes stay legal.
        G, GD = num_heads, emb_dim
    return G, GD, num_heads // G


def fuse_qkv_params(wq, bq, wk, bk, wv, bv, num_heads, *, matmul_dtype=jnp.bfloat16):
    """One-time host-side layout prep: fused (num_groups, E, 3*G*D) weight slab and
    (num_groups, 1, 3*G*D) bias slab.  Build this ONCE at weight-load time and pass it
    to masked_attention(..., fused=...) so repeated calls skip the 3*E^2 relayout."""
    E = wq.shape[0]
    D = E // num_heads
    _, GD, num_groups = _choose_head_group(num_heads, D, E)

    def group_cols(w):        # (E_in, E_out) -> (num_groups, E_in, GD); head-major cols
        return jnp.asarray(w).reshape(E, num_groups, GD).transpose(1, 0, 2)

    def group_bias(v):        # (E_out,) -> (num_groups, 1, GD)
        return jnp.asarray(v).reshape(num_groups, 1, GD)

    wqkv = jnp.concatenate([group_cols(wq), group_cols(wk), group_cols(wv)],
                           axis=-1).astype(matmul_dtype)
    bqkv = jnp.concatenate([group_bias(bq), group_bias(bk), group_bias(bv)],
                           axis=-1).astype(jnp.float32)
    return wqkv, bqkv


def masked_attention(emb, wq, bq, wk, bk, wv, bv, num_heads, *,
                     tile=128, matmul_dtype=jnp.bfloat16, fused=None):
    """Causal multi-head self-attention for a single (seq, emb) sequence.

    emb: (S, E). wq/wk/wv: (E, E) stored (in, out) so y = emb @ w + b; b*: (E,).
    matmul_dtype defaults to bf16 (MXU-native on v5e/v6e/v7x); scores, softmax and
    the output accumulation stay f32.  Pass matmul_dtype=jnp.float32 for tight
    numerics.  Pass `fused=fuse_qkv_params(...)` to reuse the fused weight slab.
    """
    S, E = emb.shape
    assert E % num_heads == 0, "emb_dim must be divisible by num_heads"
    D = E // num_heads
    G, GD, num_groups = _choose_head_group(num_heads, D, E)

    if fused is None:
        fused = fuse_qkv_params(wq, bq, wk, bk, wv, bv, num_heads,
                                matmul_dtype=matmul_dtype)
    wqkv, bqkv = fused
    assert wqkv.shape == (num_groups, E, 3 * GD)
    assert bqkv.shape == (num_groups, 1, 3 * GD)

    # --- tile (q tile == kv tile): multiple of 8; pad S up to a tile multiple.
    #     Padded key columns are automatically masked away by causality for real
    #     rows; padded query rows are sliced off below. ---
    t = max(8, min((int(tile) // 8) * 8, _round_up(S, 8)))
    S_pad = _round_up(S, t)
    n_tiles = S_pad // t

    x = emb.astype(matmul_dtype)
    if S_pad != S:
        x = jnp.pad(x, ((0, S_pad - S), (0, 0)))

    # --- VMEM budget (double-buffered inputs/outputs + scratch) ---
    md_bytes = jnp.dtype(matmul_dtype).itemsize
    out_bytes = jnp.dtype(emb.dtype).itemsize
    est_vmem = (2 * t * E * md_bytes                 # x block (double-buffered)
                + 2 * E * 3 * GD * md_bytes          # fused weight slab
                + 2 * 3 * GD * 4                     # fused bias slab
                + 2 * t * GD * out_bytes             # output block
                + t * GD * md_bytes                  # Q scratch
                + S_pad * 2 * GD * md_bytes          # projected K/V cache
                + G * t * (D + 2) * 4)               # acc / m / l scratch
    compiler_kwargs = dict(
        # Head-groups are independent ("parallel": megacore / v7x 2-TC sharding).
        # The q-tile axis carries the projected-K/V cache and the KV axis carries
        # the online-softmax state, so both must stay sequential ("arbitrary").
        dimension_semantics=("parallel", "arbitrary", "arbitrary"))
    if est_vmem > 24 * 1024 * 1024:
        # v5e defaults to a 16 MiB scoped-VMEM limit; raise it with headroom when
        # the working set demands it.  On v7x (64 MiB physical) keep the working
        # set <= ~48 MiB: bf16 + tile=128 does that for moderate E.
        compiler_kwargs["vmem_limit_bytes"] = int(min(est_vmem + (8 << 20), 96 << 20))

    kernel = functools.partial(
        _masked_attention_kernel,
        heads_per_group=G, head_dim=D, tile=t, matmul_dtype=matmul_dtype)

    out = pl.pallas_call(
        kernel,
        out_shape=jax.ShapeDtypeStruct((S_pad, E), emb.dtype),
        grid_spec=pltpu.PrefetchScalarGridSpec(
            num_scalar_prefetch=0,
            grid=(num_groups, n_tiles, n_tiles),
            in_specs=[
                # One (t, E) row block serves BOTH the Q projection (ki == 0) and the
                # diagonal K/V projection (ki == qi): fetched once per (group, q-tile),
                # never re-DMA'd along the KV axis, and no separate xkv stream at all.
                pl.BlockSpec((t, E), lambda g, qi, ki: (qi, 0)),
                pl.BlockSpec((1, E, 3 * GD), lambda g, qi, ki: (g, 0, 0)),   # fused W
                pl.BlockSpec((1, 1, 3 * GD), lambda g, qi, ki: (g, 0, 0)),   # fused b
            ],
            # Write straight into the final (S, E) layout: block (t, GD) at rows
            # qi*t, cols g*GD -> no wrapper-side transpose/reshape HBM pass.
            out_specs=pl.BlockSpec((t, GD), lambda g, qi, ki: (qi, g)),
            scratch_shapes=[
                pltpu.VMEM((t, GD), matmul_dtype),               # scaled Q
                pltpu.VMEM((n_tiles, t, 2 * GD), matmul_dtype),  # projected K|V cache
                pltpu.VMEM((G, t, D), jnp.float32),              # per-head accumulator
                pltpu.VMEM((G, t, 1), jnp.float32),              # running max
                pltpu.VMEM((G, t, 1), jnp.float32),              # running denominator
            ],
        ),
        compiler_params=pltpu.CompilerParams(**compiler_kwargs),
    )(x, wqkv, bqkv)

    return out[:S] if S_pad != S else out


def _reference(emb, wq, bq, wk, bk, wv, bv, num_heads):
    """Pure-JAX mirror of the PyTorch forward for a correctness check."""
    S, E = emb.shape
    D = E // num_heads
    q = (emb @ wq + bq).reshape(S, num_heads, D).transpose(1, 0, 2)
    k = (emb @ wk + bk).reshape(S, num_heads, D).transpose(1, 0, 2)
    v = (emb @ wv + bv).reshape(S, num_heads, D).transpose(1, 0, 2)
    s = jnp.einsum('hqd,hkd->hqk', q, k) / (D ** 0.5)
    rows = lax.broadcasted_iota(jnp.int32, s.shape, 1)
    cols = lax.broadcasted_iota(jnp.int32, s.shape, 2)
    s = s + jnp.where(cols > rows, -1e9, 0.0)
    p = jax.nn.softmax(s, axis=-1)
    attn = jnp.einsum('hqk,hkd->hqd', p, v)
    return attn.transpose(1, 0, 2).reshape(S, E)


if __name__ == "__main__":
    def run_case(seq_len, emb_dim, num_heads, case_id, matmul_dtype, tol):
        key = jax.random.fold_in(jax.random.PRNGKey(0), case_id)
        ks = jax.random.split(key, 7)
        bound = 1.0 / (emb_dim ** 0.5)
        emb = jax.random.normal(ks[0], (seq_len, emb_dim), jnp.float32)
        wq = jax.random.uniform(ks[1], (emb_dim, emb_dim), jnp.float32, -bound, bound)
        bq = jax.random.uniform(ks[2], (emb_dim,), jnp.float32, -bound, bound)
        wk = jax.random.uniform(ks[3], (emb_dim, emb_dim), jnp.float32, -bound, bound)
        bk = jax.random.uniform(ks[4], (emb_dim,), jnp.float32, -bound, bound)
        wv = jax.random.uniform(ks[5], (emb_dim, emb_dim), jnp.float32, -bound, bound)
        bv = jax.random.uniform(ks[6], (emb_dim,), jnp.float32, -bound, bound)

        # Build the fused weight slab once (cache it across calls in real use).
        fused = fuse_qkv_params(wq, bq, wk, bk, wv, bv, num_heads,
                                matmul_dtype=matmul_dtype)
        out = masked_attention(emb, wq, bq, wk, bk, wv, bv, num_heads,
                               matmul_dtype=matmul_dtype, fused=fused)
        out = jax.block_until_ready(out)
        ref = _reference(emb, wq, bq, wk, bk, wv, bv, num_heads)
        assert out.shape == (seq_len, emb_dim)
        err = float(jnp.max(jnp.abs(out - ref)))
        assert jnp.allclose(out, ref, atol=tol, rtol=tol), err

    # Small shape matching the module's forward; exact f32 MXU path, tight tolerance.
    run_case(seq_len=8, emb_dim=32, num_heads=4, case_id=0,
             matmul_dtype=jnp.float32, tol=2e-3)
    # Head grouping (2 groups of 2 heads, GD=128), multi-tile online softmax,
    # projected-K/V cache reuse and causal-tile skipping; default bf16 MXU path.
    run_case(seq_len=256, emb_dim=256, num_heads=4, case_id=1,
             matmul_dtype=jnp.bfloat16, tol=3e-2)
    # Non-multiple-of-128 seq_len exercises the padding + output-slice path.
    run_case(seq_len=200, emb_dim=128, num_heads=2, case_id=2,
             matmul_dtype=jnp.bfloat16, tol=3e-2)

    print("KERNEL_OK")
</pallas_src>

<mosaic_0001>
module attributes {stable_mosaic.version = 11 : i64} {
  func.func @_masked_attention_kernel(%arg0: i32, %arg1: i32, %arg2: i32, %arg3: memref<8x32xf32, #tpu.memory_space<vmem>>, %arg4: memref<1x32x96xf32, #tpu.memory_space<vmem>>, %arg5: memref<1x1x96xf32, #tpu.memory_space<vmem>>, %arg6: memref<8x32xf32, #tpu.memory_space<vmem>>, %arg7: memref<8x32xf32, #tpu.memory_space<vmem>>, %arg8: memref<1x8x64xf32, #tpu.memory_space<vmem>>, %arg9: memref<4x8x8xf32, #tpu.memory_space<vmem>>, %arg10: memref<4x8x1xf32, #tpu.memory_space<vmem>>, %arg11: memref<4x8x1xf32, #tpu.memory_space<vmem>>) attributes {dimension_semantics = [#tpu.dimension_semantics<parallel>, #tpu.dimension_semantics<arbitrary>, #tpu.dimension_semantics<arbitrary>], iteration_bounds = array<i64: 1, 1, 1>, scalar_prefetch = 0 : i64, scratch_operands = 5 : i64, tpu.core_type = #tpu.core_type<tc>, window_params = [{transform_indices = @transform_0, window_bounds = array<i64: 8, 32>}, {transform_indices = @transform_1, window_bounds = array<i64: 1, 32, 96>}, {transform_indices = @transform_2, window_bounds = array<i64: 1, 1, 96>}, {transform_indices = @transform_3, window_bounds = array<i64: 8, 32>}]} {
    %c0_i32 = arith.constant 0 : i32
    %0 = arith.cmpi eq, %arg2, %c0_i32 : i32
    %1 = arith.extui %0 : i1 to i32
    %c0_i32_0 = arith.constant 0 : i32
    %2 = arith.cmpi ne, %1, %c0_i32_0 : i32
    scf.if %2 {
      %c0 = arith.constant 0 : index
      %c0_3 = arith.constant 0 : index
      %9 = vector.load %arg3[%c0, %c0_3] : memref<8x32xf32, #tpu.memory_space<vmem>>, vector<8x32xf32>
      %c0_4 = arith.constant 0 : index
      %c0_5 = arith.constant 0 : index
      %c0_6 = arith.constant 0 : index
      %10 = vector.load %arg4[%c0_4, %c0_5, %c0_6] : memref<1x32x96xf32, #tpu.memory_space<vmem>>, vector<1x32x32xf32>
      %11 = vector.shape_cast %10 : vector<1x32x32xf32> to vector<32x32xf32>
      %cst = arith.constant dense<0.000000e+00> : vector<8x32xf32>
      %12 = tpu.matmul %9, %11, %cst {dimension_numbers = #tpu.dot_dimension_numbers<[1], [0], [0], [1], [0, 0, 1, 1], [], []>} : vector<8x32xf32>, vector<32x32xf32>, vector<8x32xf32> -> vector<8x32xf32>
      %c0_7 = arith.constant 0 : index
      %c0_8 = arith.constant 0 : index
      %c0_9 = arith.constant 0 : index
      %13 = vector.load %arg5[%c0_7, %c0_8, %c0_9] : memref<1x1x96xf32, #tpu.memory_space<vmem>>, vector<1x1x32xf32>
      %14 = vector.shape_cast %13 : vector<1x1x32xf32> to vector<1x32xf32>
      %15 = vector.broadcast %14 : vector<1x32xf32> to vector<8x32xf32>
      %16 = arith.addf %12, %15 : vector<8x32xf32>
      %cst_10 = arith.constant 0.353553385 : f32
      %17 = vector.broadcast %cst_10 : f32 to vector<8x32xf32>
      %18 = arith.mulf %16, %17 : vector<8x32xf32>
      %c0_11 = arith.constant 0 : index
      %c0_12 = arith.constant 0 : index
      %19 = vector.load %arg7[%c0_11, %c0_12] : memref<8x32xf32, #tpu.memory_space<vmem>>, vector<8x32xf32>
      tpu.vector_store %arg7[%c0_11, %c0_12], %18 {strides = array<i32>} : memref<8x32xf32, #tpu.memory_space<vmem>>, vector<8x32xf32>,
      %cst_13 = arith.constant 0.000000e+00 : f32
      %20 = vector.broadcast %cst_13 : f32 to vector<4x8x8xf32>
      %c0_14 = arith.constant 0 : index
      %c0_15 = arith.constant 0 : index
      %c0_16 = arith.constant 0 : index
      %21 = vector.load %arg9[%c0_14, %c0_15, %c0_16] : memref<4x8x8xf32, #tpu.memory_space<vmem>>, vector<4x8x8xf32>
      tpu.vector_store %arg9[%c0_14, %c0_15, %c0_16], %20 {strides = array<i32>} : memref<4x8x8xf32, #tpu.memory_space<vmem>>, vector<4x8x8xf32>,
      %cst_17 = arith.constant 0xFF800000 : f32
      %22 = vector.broadcast %cst_17 : f32 to vector<4x8x1xf32>
      %c0_18 = arith.constant 0 : index
      %c0_19 = arith.constant 0 : index
      %c0_20 = arith.constant 0 : index
      %23 = vector.load %arg10[%c0_18, %c0_19, %c0_20] : memref<4x8x1xf32, #tpu.memory_space<vmem>>, vector<4x8x1xf32>
      tpu.vector_store %arg10[%c0_18, %c0_19, %c0_20], %22 {strides = array<i32>} : memref<4x8x1xf32, #tpu.memory_space<vmem>>, vector<4x8x1xf32>,
      %cst_21 = arith.constant 0.000000e+00 : f32
      %24 = vector.broadcast %cst_21 : f32 to vector<4x8x1xf32>
      %c0_22 = arith.constant 0 : index
      %c0_23 = arith.constant 0 : index
      %c0_24 = arith.constant 0 : index
      %25 = vector.load %arg11[%c0_22, %c0_23, %c0_24] : memref<4x8x1xf32, #tpu.memory_space<vmem>>, vector<4x8x1xf32>
      tpu.vector_store %arg11[%c0_22, %c0_23, %c0_24], %24 {strides = array<i32>} : memref<4x8x1xf32, #tpu.memory_space<vmem>>, vector<4x8x1xf32>,
    } else {
    }
    %3 = arith.cmpi slt, %arg2, %arg1 : i32
    %4 = arith.extui %3 : i1 to i32
    %c0_i32_1 = arith.constant 0 : i32
    %5 = arith.cmpi ne, %4, %c0_i32_1 : i32
    scf.if %5 {
      %9 = arith.index_cast %arg2 : i32 to index
      %c0 = arith.constant 0 : index
      %c0_3 = arith.constant 0 : index
      %10 = vector.load %arg8[%9, %c0, %c0_3] : memref<1x8x64xf32, #tpu.memory_space<vmem>>, vector<1x8x64xf32>
      %11 = vector.shape_cast %10 : vector<1x8x64xf32> to vector<8x64xf32>
      %c0_4 = arith.constant 0 : index
      %c0_5 = arith.constant 0 : index
      %12 = vector.load %arg7[%c0_4, %c0_5] : memref<8x32xf32, #tpu.memory_space<vmem>>, vector<8x32xf32>
      %13 = vector.extract_strided_slice %12 {offsets = [0, 0], sizes = [8, 8], strides = [1, 1]} : vector<8x32xf32> to vector<8x8xf32>
      %14 = vector.extract_strided_slice %11 {offsets = [0, 0], sizes = [8, 8], strides = [1, 1]} : vector<8x64xf32> to vector<8x8xf32>
      %cst = arith.constant dense<0.000000e+00> : vector<8x8xf32>
      %15 = tpu.matmul %13, %14, %cst {dimension_numbers = #tpu.dot_dimension_numbers<[1], [1], [0], [0], [0, 0, 1, 0], [], []>} : vector<8x8xf32>, vector<8x8xf32>, vector<8x8xf32> -> vector<8x8xf32>
      %c0_6 = arith.constant 0 : index
      %c0_7 = arith.constant 0 : index
      %c0_8 = arith.constant 0 : index
      %16 = vector.load %arg10[%c0_6, %c0_7, %c0_8] : memref<4x8x1xf32, #tpu.memory_space<vmem>>, vector<1x8x1xf32>
      %17 = vector.shape_cast %16 : vector<1x8x1xf32> to vector<8x1xf32>
      %cst_9 = arith.constant dense<0xFF800000> : vector<8xf32>
      %18 = vector.multi_reduction <maximumf>, %15, %cst_9 [1] : vector<8x8xf32> to vector<8xf32>
      %19 = vector.shape_cast %18 : vector<8xf32> to vector<8x1xf32>
      %20 = arith.maximumf %17, %19 : vector<8x1xf32>
      %21 = arith.subf %17, %20 : vector<8x1xf32>
      %22 = math.exp %21 : vector<8x1xf32>
      %23 = vector.broadcast %20 : vector<8x1xf32> to vector<8x8xf32>
      %24 = arith.subf %15, %23 : vector<8x8xf32>
      %25 = math.exp %24 : vector<8x8xf32>
      %c0_10 = arith.constant 0 : index
      %c0_11 = arith.constant 0 : index
      %c0_12 = arith.constant 0 : index
      %26 = vector.load %arg11[%c0_10, %c0_11, %c0_12] : memref<4x8x1xf32, #tpu.memory_space<vmem>>, vector<1x8x1xf32>
      %27 = vector.shape_cast %26 : vector<1x8x1xf32> to vector<8x1xf32>
      %28 = arith.mulf %22, %27 : vector<8x1xf32>
      %cst_13 = arith.constant dense<0.000000e+00> : vector<8xf32>
      %29 = vector.multi_reduction <add>, %25, %cst_13 [1] : vector<8x8xf32> to vector<8xf32>
      %30 = vector.shape_cast %29 : vector<8xf32> to vector<8x1xf32>
      %31 = arith.addf %28, %30 : vector<8x1xf32>
      %c0_14 = arith.constant 0 : index
      %c0_15 = arith.constant 0 : index
      %c0_16 = arith.constant 0 : index
      %32 = vector.load %arg11[%c0_14, %c0_15, %c0_16] : memref<4x8x1xf32, #tpu.memory_space<vmem>>, vector<1x8x1xf32>
      %33 = vector.shape_cast %32 : vector<1x8x1xf32> to vector<8x1xf32>
      %34 = vector.shape_cast %31 : vector<8x1xf32> to vector<1x8x1xf32>
      tpu.vector_store %arg11[%c0_14, %c0_15, %c0_16], %34 {strides = array<i32>} : memref<4x8x1xf32, #tpu.memory_space<vmem>>, vector<1x8x1xf32>,
      %c0_17 = arith.constant 0 : index
      %c0_18 = arith.constant 0 : index
      %c0_19 = arith.constant 0 : index
      %35 = vector.load %arg9[%c0_17, %c0_18, %c0_19] : memref<4x8x8xf32, #tpu.memory_space<vmem>>, vector<1x8x8xf32>
      %36 = vector.shape_cast %35 : vector<1x8x8xf32> to vector<8x8xf32>
      %37 = vector.broadcast %22 : vector<8x1xf32> to vector<8x8xf32>
      %38 = arith.mulf %37, %36 : vector<8x8xf32>
      %39 = vector.extract_strided_slice %11 {offsets = [0, 32], sizes = [8, 8], strides = [1, 1]} : vector<8x64xf32> to vector<8x8xf32>
      %cst_20 = arith.constant dense<0.000000e+00> : vector<8x8xf32>
      %40 = tpu.matmul %25, %39, %cst_20 {dimension_numbers = #tpu.dot_dimension_numbers<[1], [0], [0], [1], [0, 0, 1, 1], [], []>} : vector<8x8xf32>, vector<8x8xf32>, vector<8x8xf32> -> vector<8x8xf32>
      %41 = arith.addf %38, %40 : vector<8x8xf32>
      %c0_21 = arith.constant 0 : index
      %c0_22 = arith.constant 0 : index
      %c0_23 = arith.constant 0 : index
      %42 = vector.load %arg9[%c0_21, %c0_22, %c0_23] : memref<4x8x8xf32, #tpu.memory_space<vmem>>, vector<1x8x8xf32>
      %43 = vector.shape_cast %42 : vector<1x8x8xf32> to vector<8x8xf32>
      %44 = vector.shape_cast %41 : vector<8x8xf32> to vector<1x8x8xf32>
      tpu.vector_store %arg9[%c0_21, %c0_22, %c0_23], %44 {strides = array<i32>} : memref<4x8x8xf32, #tpu.memory_space<vmem>>, vector<1x8x8xf32>,
      %c0_24 = arith.constant 0 : index
      %c0_25 = arith.constant 0 : index
      %c0_26 = arith.constant 0 : index
      %45 = vector.load %arg10[%c0_24, %c0_25, %c0_26] : memref<4x8x1xf32, #tpu.memory_space<vmem>>, vector<1x8x1xf32>
      %46 = vector.shape_cast %45 : vector<1x8x1xf32> to vector<8x1xf32>
      %47 = vector.shape_cast %20 : vector<8x1xf32> to vector<1x8x1xf32>
      tpu.vector_store %arg10[%c0_24, %c0_25, %c0_26], %47 {strides = array<i32>} : memref<4x8x1xf32, #tpu.memory_space<vmem>>, vector<1x8x1xf32>,
      %48 = vector.extract_strided_slice %12 {offsets = [0, 8], sizes = [8, 8], strides = [1, 1]} : vector<8x32xf32> to vector<8x8xf32>
      %49 = vector.extract_strided_slice %11 {offsets = [0, 8], sizes = [8, 8], strides = [1, 1]} : vector<8x64xf32> to vector<8x8xf32>
      %cst_27 = arith.constant dense<0.000000e+00> : vector<8x8xf32>
      %50 = tpu.matmul %48, %49, %cst_27 {dimension_numbers = #tpu.dot_dimension_numbers<[1], [1], [0], [0], [0, 0, 1, 0], [], []>} : vector<8x8xf32>, vector<8x8xf32>, vector<8x8xf32> -> vector<8x8xf32>
      %c1 = arith.constant 1 : index
      %c0_28 = arith.constant 0 : index
      %c0_29 = arith.constant 0 : index
      %51 = vector.load %arg10[%c1, %c0_28, %c0_29] : memref<4x8x1xf32, #tpu.memory_space<vmem>>, vector<1x8x1xf32>
      %52 = vector.shape_cast %51 : vector<1x8x1xf32> to vector<8x1xf32>
      %cst_30 = arith.constant dense<0xFF800000> : vector<8xf32>
      %53 = vector.multi_reduction <maximumf>, %50, %cst_30 [1] : vector<8x8xf32> to vector<8xf32>
      %54 = vector.shape_cast %53 : vector<8xf32> to vector<8x1xf32>
      %55 = arith.maximumf %52, %54 : vector<8x1xf32>
      %56 = arith.subf %52, %55 : vector<8x1xf32>
      %57 = math.exp %56 : vector<8x1xf32>
      %58 = vector.broadcast %55 : vector<8x1xf32> to vector<8x8xf32>
      %59 = arith.subf %50, %58 : vector<8x8xf32>
      %60 = math.exp %59 : vector<8x8xf32>
      %c1_31 = arith.constant 1 : index
      %c0_32 = arith.constant 0 : index
      %c0_33 = arith.constant 0 : index
      %61 = vector.load %arg11[%c1_31, %c0_32, %c0_33] : memref<4x8x1xf32, #tpu.memory_space<vmem>>, vector<1x8x1xf32>
      %62 = vector.shape_cast %61 : vector<1x8x1xf32> to vector<8x1xf32>
      %63 = arith.mulf %57, %62 : vector<8x1xf32>
      %cst_34 = arith.constant dense<0.000000e+00> : vector<8xf32>
      %64 = vector.multi_reduction <add>, %60, %cst_34 [1] : vector<8x8xf32> to vector<8xf32>
      %65 = vector.shape_cast %64 : vector<8xf32> to vector<8x1xf32>
      %66 = arith.addf %63, %65 : vector<8x1xf32>
      %c1_35 = arith.constant 1 : index
      %c0_36 = arith.constant 0 : index
      %c0_37 = arith.constant 0 : index
      %67 = vector.load %arg11[%c1_35, %c0_36, %c0_37] : memref<4x8x1xf32, #tpu.memory_space<vmem>>, vector<1x8x1xf32>
      %68 = vector.shape_cast %67 : vector<1x8x1xf32> to vector<8x1xf32>
      %69 = vector.shape_cast %66 : vector<8x1xf32> to vector<1x8x1xf32>
      tpu.vector_store %arg11[%c1_35, %c0_36, %c0_37], %69 {strides = array<i32>} : memref<4x8x1xf32, #tpu.memory_space<vmem>>, vector<1x8x1xf32>,
      %c1_38 = arith.constant 1 : index
      %c0_39 = arith.constant 0 : index
      %c0_40 = arith.constant 0 : index
      %70 = vector.load %arg9[%c1_38, %c0_39, %c0_40] : memref<4x8x8xf32, #tpu.memory_space<vmem>>, vector<1x8x8xf32>
      %71 = vector.shape_cast %70 : vector<1x8x8xf32> to vector<8x8xf32>
      %72 = vector.broadcast %57 : vector<8x1xf32> to vector<8x8xf32>
      %73 = arith.mulf %72, %71 : vector<8x8xf32>
      %74 = vector.extract_strided_slice %11 {offsets = [0, 40], sizes = [8, 8], strides = [1, 1]} : vector<8x64xf32> to vector<8x8xf32>
      %cst_41 = arith.constant dense<0.000000e+00> : vector<8x8xf32>
      %75 = tpu.matmul %60, %74, %cst_41 {dimension_numbers = #tpu.dot_dimension_numbers<[1], [0], [0], [1], [0, 0, 1, 1], [], []>} : vector<8x8xf32>, vector<8x8xf32>, vector<8x8xf32> -> vector<8x8xf32>
      %76 = arith.addf %73, %75 : vector<8x8xf32>
      %c1_42 = arith.constant 1 : index
      %c0_43 = arith.constant 0 : index
      %c0_44 = arith.constant 0 : index
      %77 = vector.load %arg9[%c1_42, %c0_43, %c0_44] : memref<4x8x8xf32, #tpu.memory_space<vmem>>, vector<1x8x8xf32>
      %78 = vector.shape_cast %77 : vector<1x8x8xf32> to vector<8x8xf32>
      %79 = vector.shape_cast %76 : vector<8x8xf32> to vector<1x8x8xf32>
      tpu.vector_store %arg9[%c1_42, %c0_43, %c0_44], %79 {strides = array<i32>} : memref<4x8x8xf32, #tpu.memory_space<vmem>>, vector<1x8x8xf32>,
      %c1_45 = arith.constant 1 : index
      %c0_46 = arith.constant 0 : index
      %c0_47 = arith.constant 0 : index
      %80 = vector.load %arg10[%c1_45, %c0_46, %c0_47] : memref<4x8x1xf32, #tpu.memory_space<vmem>>, vector<1x8x1xf32>
      %81 = vector.shape_cast %80 : vector<1x8x1xf32> to vector<8x1xf32>
      %82 = vector.shape_cast %55 : vector<8x1xf32> to vector<1x8x1xf32>
      tpu.vector_store %arg10[%c1_45, %c0_46, %c0_47], %82 {strides = array<i32>} : memref<4x8x1xf32, #tpu.memory_space<vmem>>, vector<1x8x1xf32>,
      %83 = vector.extract_strided_slice %12 {offsets = [0, 16], sizes = [8, 8], strides = [1, 1]} : vector<8x32xf32> to vector<8x8xf32>
      %84 = vector.extract_strided_slice %11 {offsets = [0, 16], sizes = [8, 8], strides = [1, 1]} : vector<8x64xf32> to vector<8x8xf32>
      %cst_48 = arith.constant dense<0.000000e+00> : vector<8x8xf32>
      %85 = tpu.matmul %83, %84, %cst_48 {dimension_numbers = #tpu.dot_dimension_numbers<[1], [1], [0], [0], [0, 0, 1, 0], [], []>} : vector<8x8xf32>, vector<8x8xf32>, vector<8x8xf32> -> vector<8x8xf32>
      %c2 = arith.constant 2 : index
      %c0_49 = arith.constant 0 : index
      %c0_50 = arith.constant 0 : index
      %86 = vector.load %arg10[%c2, %c0_49, %c0_50] : memref<4x8x1xf32, #tpu.memory_space<vmem>>, vector<1x8x1xf32>
      %87 = vector.shape_cast %86 : vector<1x8x1xf32> to vector<8x1xf32>
      %cst_51 = arith.constant dense<0xFF800000> : vector<8xf32>
      %88 = vector.multi_reduction <maximumf>, %85, %cst_51 [1] : vector<8x8xf32> to vector<8xf32>
      %89 = vector.shape_cast %88 : vector<8xf32> to vector<8x1xf32>
      %90 = arith.maximumf %87, %89 : vector<8x1xf32>
      %91 = arith.subf %87, %90 : vector<8x1xf32>
      %92 = math.exp %91 : vector<8x1xf32>
      %93 = vector.broadcast %90 : vector<8x1xf32> to vector<8x8xf32>
      %94 = arith.subf %85, %93 : vector<8x8xf32>
      %95 = math.exp %94 : vector<8x8xf32>
      %c2_52 = arith.constant 2 : index
      %c0_53 = arith.constant 0 : index
      %c0_54 = arith.constant 0 : index
      %96 = vector.load %arg11[%c2_52, %c0_53, %c0_54] : memref<4x8x1xf32, #tpu.memory_space<vmem>>, vector<1x8x1xf32>
      %97 = vector.shape_cast %96 : vector<1x8x1xf32> to vector<8x1xf32>
      %98 = arith.mulf %92, %97 : vector<8x1xf32>
      %cst_55 = arith.constant dense<0.000000e+00> : vector<8xf32>
      %99 = vector.multi_reduction <add>, %95, %cst_55 [1] : vector<8x8xf32> to vector<8xf32>
      %100 = vector.shape_cast %99 : vector<8xf32> to vector<8x1xf32>
      %101 = arith.addf %98, %100 : vector<8x1xf32>
      %c2_56 = arith.constant 2 : index
      %c0_57 = arith.constant 0 : index
      %c0_58 = arith.constant 0 : index
      %102 = vector.load %arg11[%c2_56, %c0_57, %c0_58] : memref<4x8x1xf32, #tpu.memory_space<vmem>>, vector<1x8x1xf32>
      %103 = vector.shape_cast %102 : vector<1x8x1xf32> to vector<8x1xf32>
      %104 = vector.shape_cast %101 : vector<8x1xf32> to vector<1x8x1xf32>
      tpu.vector_store %arg11[%c2_56, %c0_57, %c0_58], %104 {strides = array<i32>} : memref<4x8x1xf32, #tpu.memory_space<vmem>>, vector<1x8x1xf32>,
      %c2_59 = arith.constant 2 : index
      %c0_60 = arith.constant 0 : index
      %c0_61 = arith.constant 0 : index
      %105 = vector.load %arg9[%c2_59, %c0_60, %c0_61] : memref<4x8x8xf32, #tpu.memory_space<vmem>>, vector<1x8x8xf32>
      %106 = vector.shape_cast %105 : vector<1x8x8xf32> to vector<8x8xf32>
      %107 = vector.broadcast %92 : vector<8x1xf32> to vector<8x8xf32>
      %108 = arith.mulf %107, %106 : vector<8x8xf32>
      %109 = vector.extract_strided_slice %11 {offsets = [0, 48], sizes = [8, 8], strides = [1, 1]} : vector<8x64xf32> to vector<8x8xf32>
      %cst_62 = arith.constant dense<0.000000e+00> : vector<8x8xf32>
      %110 = tpu.matmul %95, %109, %cst_62 {dimension_numbers = #tpu.dot_dimension_numbers<[1], [0], [0], [1], [0, 0, 1, 1], [], []>} : vector<8x8xf32>, vector<8x8xf32>, vector<8x8xf32> -> vector<8x8xf32>
      %111 = arith.addf %108, %110 : vector<8x8xf32>
      %c2_63 = arith.constant 2 : index
      %c0_64 = arith.constant 0 : index
      %c0_65 = arith.constant 0 : index
      %112 = vector.load %arg9[%c2_63, %c0_64, %c0_65] : memref<4x8x8xf32, #tpu.memory_space<vmem>>, vector<1x8x8xf32>
      %113 = vector.shape_cast %112 : vector<1x8x8xf32> to vector<8x8xf32>
      %114 = vector.shape_cast %111 : vector<8x8xf32> to vector<1x8x8xf32>
      tpu.vector_store %arg9[%c2_63, %c0_64, %c0_65], %114 {strides = array<i32>} : memref<4x8x8xf32, #tpu.memory_space<vmem>>, vector<1x8x8xf32>,
      %c2_66 = arith.constant 2 : index
      %c0_67 = arith.constant 0 : index
      %c0_68 = arith.constant 0 : index
      %115 = vector.load %arg10[%c2_66, %c0_67, %c0_68] : memref<4x8x1xf32, #tpu.memory_space<vmem>>, vector<1x8x1xf32>
      %116 = vector.shape_cast %115 : vector<1x8x1xf32> to vector<8x1xf32>
      %117 = vector.shape_cast %90 : vector<8x1xf32> to vector<1x8x1xf32>
      tpu.vector_store %arg10[%c2_66, %c0_67, %c0_68], %117 {strides = array<i32>} : memref<4x8x1xf32, #tpu.memory_space<vmem>>, vector<1x8x1xf32>,
      %118 = vector.extract_strided_slice %12 {offsets = [0, 24], sizes = [8, 8], strides = [1, 1]} : vector<8x32xf32> to vector<8x8xf32>
      %119 = vector.extract_strided_slice %11 {offsets = [0, 24], sizes = [8, 8], strides = [1, 1]} : vector<8x64xf32> to vector<8x8xf32>
      %cst_69 = arith.constant dense<0.000000e+00> : vector<8x8xf32>
      %120 = tpu.matmul %118, %119, %cst_69 {dimension_numbers = #tpu.dot_dimension_numbers<[1], [1], [0], [0], [0, 0, 1, 0], [], []>} : vector<8x8xf32>, vector<8x8xf32>, vector<8x8xf32> -> vector<8x8xf32>
      %c3 = arith.constant 3 : index
      %c0_70 = arith.constant 0 : index
      %c0_71 = arith.constant 0 : index
      %121 = vector.load %arg10[%c3, %c0_70, %c0_71] : memref<4x8x1xf32, #tpu.memory_space<vmem>>, vector<1x8x1xf32>
      %122 = vector.shape_cast %121 : vector<1x8x1xf32> to vector<8x1xf32>
      %cst_72 = arith.constant dense<0xFF800000> : vector<8xf32>
      %123 = vector.multi_reduction <maximumf>, %120, %cst_72 [1] : vector<8x8xf32> to vector<8xf32>
      %124 = vector.shape_cast %123 : vector<8xf32> to vector<8x1xf32>
      %125 = arith.maximumf %122, %124 : vector<8x1xf32>
      %126 = arith.subf %122, %125 : vector<8x1xf32>
      %127 = math.exp %126 : vector<8x1xf32>
      %128 = vector.broadcast %125 : vector<8x1xf32> to vector<8x8xf32>
      %129 = arith.subf %120, %128 : vector<8x8xf32>
      %130 = math.exp %129 : vector<8x8xf32>
      %c3_73 = arith.constant 3 : index
      %c0_74 = arith.constant 0 : index
      %c0_75 = arith.constant 0 : index
      %131 = vector.load %arg11[%c3_73, %c0_74, %c0_75] : memref<4x8x1xf32, #tpu.memory_space<vmem>>, vector<1x8x1xf32>
      %132 = vector.shape_cast %131 : vector<1x8x1xf32> to vector<8x1xf32>
      %133 = arith.mulf %127, %132 : vector<8x1xf32>
      %cst_76 = arith.constant dense<0.000000e+00> : vector<8xf32>
      %134 = vector.multi_reduction <add>, %130, %cst_76 [1] : vector<8x8xf32> to vector<8xf32>
      %135 = vector.shape_cast %134 : vector<8xf32> to vector<8x1xf32>
      %136 = arith.addf %133, %135 : vector<8x1xf32>
      %c3_77 = arith.constant 3 : index
      %c0_78 = arith.constant 0 : index
      %c0_79 = arith.constant 0 : index
      %137 = vector.load %arg11[%c3_77, %c0_78, %c0_79] : memref<4x8x1xf32, #tpu.memory_space<vmem>>, vector<1x8x1xf32>
      %138 = vector.shape_cast %137 : vector<1x8x1xf32> to vector<8x1xf32>
      %139 = vector.shape_cast %136 : vector<8x1xf32> to vector<1x8x1xf32>
      tpu.vector_store %arg11[%c3_77, %c0_78, %c0_79], %139 {strides = array<i32>} : memref<4x8x1xf32, #tpu.memory_space<vmem>>, vector<1x8x1xf32>,
      %c3_80 = arith.constant 3 : index
      %c0_81 = arith.constant 0 : index
      %c0_82 = arith.constant 0 : index
      %140 = vector.load %arg9[%c3_80, %c0_81, %c0_82] : memref<4x8x8xf32, #tpu.memory_space<vmem>>, vector<1x8x8xf32>
      %141 = vector.shape_cast %140 : vector<1x8x8xf32> to vector<8x8xf32>
      %142 = vector.broadcast %127 : vector<8x1xf32> to vector<8x8xf32>
      %143 = arith.mulf %142, %141 : vector<8x8xf32>
      %144 = vector.extract_strided_slice %11 {offsets = [0, 56], sizes = [8, 8], strides = [1, 1]} : vector<8x64xf32> to vector<8x8xf32>
      %cst_83 = arith.constant dense<0.000000e+00> : vector<8x8xf32>
      %145 = tpu.matmul %130, %144, %cst_83 {dimension_numbers = #tpu.dot_dimension_numbers<[1], [0], [0], [1], [0, 0, 1, 1], [], []>} : vector<8x8xf32>, vector<8x8xf32>, vector<8x8xf32> -> vector<8x8xf32>
      %146 = arith.addf %143, %145 : vector<8x8xf32>
      %c3_84 = arith.constant 3 : index
      %c0_85 = arith.constant 0 : index
      %c0_86 = arith.constant 0 : index
      %147 = vector.load %arg9[%c3_84, %c0_85, %c0_86] : memref<4x8x8xf32, #tpu.memory_space<vmem>>, vector<1x8x8xf32>
      %148 = vector.shape_cast %147 : vector<1x8x8xf32> to vector<8x8xf32>
      %149 = vector.shape_cast %146 : vector<8x8xf32> to vector<1x8x8xf32>
      tpu.vector_store %arg9[%c3_84, %c0_85, %c0_86], %149 {strides = array<i32>} : memref<4x8x8xf32, #tpu.memory_space<vmem>>, vector<1x8x8xf32>,
      %c3_87 = arith.constant 3 : index
      %c0_88 = arith.constant 0 : index
      %c0_89 = arith.constant 0 : index
      %150 = vector.load %arg10[%c3_87, %c0_88, %c0_89] : memref<4x8x1xf32, #tpu.memory_space<vmem>>, vector<1x8x1xf32>
      %151 = vector.shape_cast %150 : vector<1x8x1xf32> to vector<8x1xf32>
      %152 = vector.shape_cast %125 : vector<8x1xf32> to vector<1x8x1xf32>
      tpu.vector_store %arg10[%c3_87, %c0_88, %c0_89], %152 {strides = array<i32>} : memref<4x8x1xf32, #tpu.memory_space<vmem>>, vector<1x8x1xf32>,
    } else {
    }
    %6 = arith.cmpi eq, %arg2, %arg1 : i32
    %7 = arith.extui %6 : i1 to i32
    %c0_i32_2 = arith.constant 0 : i32
    %8 = arith.cmpi ne, %7, %c0_i32_2 : i32
    scf.if %8 {
      %c0 = arith.constant 0 : index
      %c0_3 = arith.constant 0 : index
      %9 = vector.load %arg3[%c0, %c0_3] : memref<8x32xf32, #tpu.memory_space<vmem>>, vector<8x32xf32>
      %c0_4 = arith.constant 0 : index
      %c0_5 = arith.constant 0 : index
      %c32 = arith.constant 32 : index
      %10 = vector.load %arg4[%c0_4, %c0_5, %c32] : memref<1x32x96xf32, #tpu.memory_space<vmem>>, vector<1x32x64xf32>
      %11 = vector.shape_cast %10 : vector<1x32x64xf32> to vector<32x64xf32>
      %cst = arith.constant dense<0.000000e+00> : vector<8x64xf32>
      %12 = tpu.matmul %9, %11, %cst {dimension_numbers = #tpu.dot_dimension_numbers<[1], [0], [0], [1], [0, 0, 1, 1], [], []>} : vector<8x32xf32>, vector<32x64xf32>, vector<8x64xf32> -> vector<8x64xf32>
      %c0_6 = arith.constant 0 : index
      %c0_7 = arith.constant 0 : index
      %c32_8 = arith.constant 32 : index
      %13 = vector.load %arg5[%c0_6, %c0_7, %c32_8] : memref<1x1x96xf32, #tpu.memory_space<vmem>>, vector<1x1x64xf32>
      %14 = vector.shape_cast %13 : vector<1x1x64xf32> to vector<1x64xf32>
      %15 = vector.broadcast %14 : vector<1x64xf32> to vector<8x64xf32>
      %16 = arith.addf %12, %15 : vector<8x64xf32>
      %17 = arith.index_cast %arg2 : i32 to index
      %c0_9 = arith.constant 0 : index
      %c0_10 = arith.constant 0 : index
      %18 = vector.load %arg8[%17, %c0_9, %c0_10] : memref<1x8x64xf32, #tpu.memory_space<vmem>>, vector<1x8x64xf32>
      %19 = vector.shape_cast %18 : vector<1x8x64xf32> to vector<8x64xf32>
      %20 = vector.shape_cast %16 : vector<8x64xf32> to vector<1x8x64xf32>
      tpu.vector_store %arg8[%17, %c0_9, %c0_10], %20 {strides = array<i32>} : memref<1x8x64xf32, #tpu.memory_space<vmem>>, vector<1x8x64xf32>,
      %21 = tpu.iota {dimensions = array<i32: 0>} : vector<8x8xi32>
      %22 = tpu.iota {dimensions = array<i32: 1>} : vector<8x8xi32>
      %23 = arith.cmpi sgt, %22, %21 : vector<8x8xi32>
      %cst_11 = arith.constant -1.000000e+09 : f32
      %cst_12 = arith.constant 0.000000e+00 : f32
      %24 = vector.broadcast %cst_11 : f32 to vector<8x8xf32>
      %25 = vector.broadcast %cst_12 : f32 to vector<8x8xf32>
      %26 = arith.select %23, %24, %25 : vector<8x8xi1>, vector<8x8xf32>
      %c0_13 = arith.constant 0 : index
      %c0_14 = arith.constant 0 : index
      %27 = vector.load %arg7[%c0_13, %c0_14] : memref<8x32xf32, #tpu.memory_space<vmem>>, vector<8x32xf32>
      %28 = vector.extract_strided_slice %27 {offsets = [0, 0], sizes = [8, 8], strides = [1, 1]} : vector<8x32xf32> to vector<8x8xf32>
      %29 = vector.extract_strided_slice %16 {offsets = [0, 0], sizes = [8, 8], strides = [1, 1]} : vector<8x64xf32> to vector<8x8xf32>
      %cst_15 = arith.constant dense<0.000000e+00> : vector<8x8xf32>
      %30 = tpu.matmul %28, %29, %cst_15 {dimension_numbers = #tpu.dot_dimension_numbers<[1], [1], [0], [0], [0, 0, 1, 0], [], []>} : vector<8x8xf32>, vector<8x8xf32>, vector<8x8xf32> -> vector<8x8xf32>
      %31 = arith.addf %30, %26 : vector<8x8xf32>
      %c0_16 = arith.constant 0 : index
      %c0_17 = arith.constant 0 : index
      %c0_18 = arith.constant 0 : index
      %32 = vector.load %arg10[%c0_16, %c0_17, %c0_18] : memref<4x8x1xf32, #tpu.memory_space<vmem>>, vector<1x8x1xf32>
      %33 = vector.shape_cast %32 : vector<1x8x1xf32> to vector<8x1xf32>
      %cst_19 = arith.constant dense<0xFF800000> : vector<8xf32>
      %34 = vector.multi_reduction <maximumf>, %31, %cst_19 [1] : vector<8x8xf32> to vector<8xf32>
      %35 = vector.shape_cast %34 : vector<8xf32> to vector<8x1xf32>
      %36 = arith.maximumf %33, %35 : vector<8x1xf32>
      %37 = arith.subf %33, %36 : vector<8x1xf32>
      %38 = math.exp %37 : vector<8x1xf32>
      %39 = vector.broadcast %36 : vector<8x1xf32> to vector<8x8xf32>
      %40 = arith.subf %31, %39 : vector<8x8xf32>
      %41 = math.exp %40 : vector<8x8xf32>
      %c0_20 = arith.constant 0 : index
      %c0_21 = arith.constant 0 : index
      %c0_22 = arith.constant 0 : index
      %42 = vector.load %arg11[%c0_20, %c0_21, %c0_22] : memref<4x8x1xf32, #tpu.memory_space<vmem>>, vector<1x8x1xf32>
      %43 = vector.shape_cast %42 : vector<1x8x1xf32> to vector<8x1xf32>
      %44 = arith.mulf %38, %43 : vector<8x1xf32>
      %cst_23 = arith.constant dense<0.000000e+00> : vector<8xf32>
      %45 = vector.multi_reduction <add>, %41, %cst_23 [1] : vector<8x8xf32> to vector<8xf32>
      %46 = vector.shape_cast %45 : vector<8xf32> to vector<8x1xf32>
      %47 = arith.addf %44, %46 : vector<8x1xf32>
      %c0_24 = arith.constant 0 : index
      %c0_25 = arith.constant 0 : index
      %c0_26 = arith.constant 0 : index
      %48 = vector.load %arg11[%c0_24, %c0_25, %c0_26] : memref<4x8x1xf32, #tpu.memory_space<vmem>>, vector<1x8x1xf32>
      %49 = vector.shape_cast %48 : vector<1x8x1xf32> to vector<8x1xf32>
      %50 = vector.shape_cast %47 : vector<8x1xf32> to vector<1x8x1xf32>
      tpu.vector_store %arg11[%c0_24, %c0_25, %c0_26], %50 {strides = array<i32>} : memref<4x8x1xf32, #tpu.memory_space<vmem>>, vector<1x8x1xf32>,
      %c0_27 = arith.constant 0 : index
      %c0_28 = arith.constant 0 : index
      %c0_29 = arith.constant 0 : index
      %51 = vector.load %arg9[%c0_27, %c0_28, %c0_29] : memref<4x8x8xf32, #tpu.memory_space<vmem>>, vector<1x8x8xf32>
      %52 = vector.shape_cast %51 : vector<1x8x8xf32> to vector<8x8xf32>
      %53 = vector.broadcast %38 : vector<8x1xf32> to vector<8x8xf32>
      %54 = arith.mulf %53, %52 : vector<8x8xf32>
      %55 = vector.extract_strided_slice %16 {offsets = [0, 32], sizes = [8, 8], strides = [1, 1]} : vector<8x64xf32> to vector<8x8xf32>
      %cst_30 = arith.constant dense<0.000000e+00> : vector<8x8xf32>
      %56 = tpu.matmul %41, %55, %cst_30 {dimension_numbers = #tpu.dot_dimension_numbers<[1], [0], [0], [1], [0, 0, 1, 1], [], []>} : vector<8x8xf32>, vector<8x8xf32>, vector<8x8xf32> -> vector<8x8xf32>
      %57 = arith.addf %54, %56 : vector<8x8xf32>
      %c0_31 = arith.constant 0 : index
      %c0_32 = arith.constant 0 : index
      %c0_33 = arith.constant 0 : index
      %58 = vector.load %arg9[%c0_31, %c0_32, %c0_33] : memref<4x8x8xf32, #tpu.memory_space<vmem>>, vector<1x8x8xf32>
      %59 = vector.shape_cast %58 : vector<1x8x8xf32> to vector<8x8xf32>
      %60 = vector.shape_cast %57 : vector<8x8xf32> to vector<1x8x8xf32>
      tpu.vector_store %arg9[%c0_31, %c0_32, %c0_33], %60 {strides = array<i32>} : memref<4x8x8xf32, #tpu.memory_space<vmem>>, vector<1x8x8xf32>,
      %c0_34 = arith.constant 0 : index
      %c0_35 = arith.constant 0 : index
      %c0_36 = arith.constant 0 : index
      %61 = vector.load %arg10[%c0_34, %c0_35, %c0_36] : memref<4x8x1xf32, #tpu.memory_space<vmem>>, vector<1x8x1xf32>
      %62 = vector.shape_cast %61 : vector<1x8x1xf32> to vector<8x1xf32>
      %63 = vector.shape_cast %36 : vector<8x1xf32> to vector<1x8x1xf32>
      tpu.vector_store %arg10[%c0_34, %c0_35, %c0_36], %63 {strides = array<i32>} : memref<4x8x1xf32, #tpu.memory_space<vmem>>, vector<1x8x1xf32>,
      %64 = vector.extract_strided_slice %27 {offsets = [0, 8], sizes = [8, 8], strides = [1, 1]} : vector<8x32xf32> to vector<8x8xf32>
      %65 = vector.extract_strided_slice %16 {offsets = [0, 8], sizes = [8, 8], strides = [1, 1]} : vector<8x64xf32> to vector<8x8xf32>
      %cst_37 = arith.constant dense<0.000000e+00> : vector<8x8xf32>
      %66 = tpu.matmul %64, %65, %cst_37 {dimension_numbers = #tpu.dot_dimension_numbers<[1], [1], [0], [0], [0, 0, 1, 0], [], []>} : vector<8x8xf32>, vector<8x8xf32>, vector<8x8xf32> -> vector<8x8xf32>
      %67 = arith.addf %66, %26 : vector<8x8xf32>
      %c1 = arith.constant 1 : index
      %c0_38 = arith.constant 0 : index
      %c0_39 = arith.constant 0 : index
      %68 = vector.load %arg10[%c1, %c0_38, %c0_39] : memref<4x8x1xf32, #tpu.memory_space<vmem>>, vector<1x8x1xf32>
      %69 = vector.shape_cast %68 : vector<1x8x1xf32> to vector<8x1xf32>
      %cst_40 = arith.constant dense<0xFF800000> : vector<8xf32>
      %70 = vector.multi_reduction <maximumf>, %67, %cst_40 [1] : vector<8x8xf32> to vector<8xf32>
      %71 = vector.shape_cast %70 : vector<8xf32> to vector<8x1xf32>
      %72 = arith.maximumf %69, %71 : vector<8x1xf32>
      %73 = arith.subf %69, %72 : vector<8x1xf32>
      %74 = math.exp %73 : vector<8x1xf32>
      %75 = vector.broadcast %72 : vector<8x1xf32> to vector<8x8xf32>
      %76 = arith.subf %67, %75 : vector<8x8xf32>
      %77 = math.exp %76 : vector<8x8xf32>
      %c1_41 = arith.constant 1 : index
      %c0_42 = arith.constant 0 : index
      %c0_43 = arith.constant 0 : index
      %78 = vector.load %arg11[%c1_41, %c0_42, %c0_43] : memref<4x8x1xf32, #tpu.memory_space<vmem>>, vector<1x8x1xf32>
      %79 = vector.shape_cast %78 : vector<1x8x1xf32> to vector<8x1xf32>
      %80 = arith.mulf %74, %79 : vector<8x1xf32>
      %cst_44 = arith.constant dense<0.000000e+00> : vector<8xf32>
      %81 = vector.multi_reduction <add>, %77, %cst_44 [1] : vector<8x8xf32> to vector<8xf32>
      %82 = vector.shape_cast %81 : vector<8xf32> to vector<8x1xf32>
      %83 = arith.addf %80, %82 : vector<8x1xf32>
      %c1_45 = arith.constant 1 : index
      %c0_46 = arith.constant 0 : index
      %c0_47 = arith.constant 0 : index
      %84 = vector.load %arg11[%c1_45, %c0_46, %c0_47] : memref<4x8x1xf32, #tpu.memory_space<vmem>>, vector<1x8x1xf32>
      %85 = vector.shape_cast %84 : vector<1x8x1xf32> to vector<8x1xf32>
      %86 = vector.shape_cast %83 : vector<8x1xf32> to vector<1x8x1xf32>
      tpu.vector_store %arg11[%c1_45, %c0_46, %c0_47], %86 {strides = array<i32>} : memref<4x8x1xf32, #tpu.memory_space<vmem>>, vector<1x8x1xf32>,
      %c1_48 = arith.constant 1 : index
      %c0_49 = arith.constant 0 : index
      %c0_50 = arith.constant 0 : index
      %87 = vector.load %arg9[%c1_48, %c0_49, %c0_50] : memref<4x8x8xf32, #tpu.memory_space<vmem>>, vector<1x8x8xf32>
      %88 = vector.shape_cast %87 : vector<1x8x8xf32> to vector<8x8xf32>
      %89 = vector.broadcast %74 : vector<8x1xf32> to vector<8x8xf32>
      %90 = arith.mulf %89, %88 : vector<8x8xf32>
      %91 = vector.extract_strided_slice %16 {offsets = [0, 40], sizes = [8, 8], strides = [1, 1]} : vector<8x64xf32> to vector<8x8xf32>
      %cst_51 = arith.constant dense<0.000000e+00> : vector<8x8xf32>
      %92 = tpu.matmul %77, %91, %cst_51 {dimension_numbers = #tpu.dot_dimension_numbers<[1], [0], [0], [1], [0, 0, 1, 1], [], []>} : vector<8x8xf32>, vector<8x8xf32>, vector<8x8xf32> -> vector<8x8xf32>
      %93 = arith.addf %90, %92 : vector<8x8xf32>
      %c1_52 = arith.constant 1 : index
      %c0_53 = arith.constant 0 : index
      %c0_54 = arith.constant 0 : index
      %94 = vector.load %arg9[%c1_52, %c0_53, %c0_54] : memref<4x8x8xf32, #tpu.memory_space<vmem>>, vector<1x8x8xf32>
      %95 = vector.shape_cast %94 : vector<1x8x8xf32> to vector<8x8xf32>
      %96 = vector.shape_cast %93 : vector<8x8xf32> to vector<1x8x8xf32>
      tpu.vector_store %arg9[%c1_52, %c0_53, %c0_54], %96 {strides = array<i32>} : memref<4x8x8xf32, #tpu.memory_space<vmem>>, vector<1x8x8xf32>,
      %c1_55 = arith.constant 1 : index
      %c0_56 = arith.constant 0 : index
      %c0_57 = arith.constant 0 : index
      %97 = vector.load %arg10[%c1_55, %c0_56, %c0_57] : memref<4x8x1xf32, #tpu.memory_space<vmem>>, vector<1x8x1xf32>
      %98 = vector.shape_cast %97 : vector<1x8x1xf32> to vector<8x1xf32>
      %99 = vector.shape_cast %72 : vector<8x1xf32> to vector<1x8x1xf32>
      tpu.vector_store %arg10[%c1_55, %c0_56, %c0_57], %99 {strides = array<i32>} : memref<4x8x1xf32, #tpu.memory_space<vmem>>, vector<1x8x1xf32>,
      %100 = vector.extract_strided_slice %27 {offsets = [0, 16], sizes = [8, 8], strides = [1, 1]} : vector<8x32xf32> to vector<8x8xf32>
      %101 = vector.extract_strided_slice %16 {offsets = [0, 16], sizes = [8, 8], strides = [1, 1]} : vector<8x64xf32> to vector<8x8xf32>
      %cst_58 = arith.constant dense<0.000000e+00> : vector<8x8xf32>
      %102 = tpu.matmul %100, %101, %cst_58 {dimension_numbers = #tpu.dot_dimension_numbers<[1], [1], [0], [0], [0, 0, 1, 0], [], []>} : vector<8x8xf32>, vector<8x8xf32>, vector<8x8xf32> -> vector<8x8xf32>
      %103 = arith.addf %102, %26 : vector<8x8xf32>
      %c2 = arith.constant 2 : index
      %c0_59 = arith.constant 0 : index
      %c0_60 = arith.constant 0 : index
      %104 = vector.load %arg10[%c2, %c0_59, %c0_60] : memref<4x8x1xf32, #tpu.memory_space<vmem>>, vector<1x8x1xf32>
      %105 = vector.shape_cast %104 : vector<1x8x1xf32> to vector<8x1xf32>
      %cst_61 = arith.constant dense<0xFF800000> : vector<8xf32>
      %106 = vector.multi_reduction <maximumf>, %103, %cst_61 [1] : vector<8x8xf32> to vector<8xf32>
      %107 = vector.shape_cast %106 : vector<8xf32> to vector<8x1xf32>
      %108 = arith.maximumf %105, %107 : vector<8x1xf32>
      %109 = arith.subf %105, %108 : vector<8x1xf32>
      %110 = math.exp %109 : vector<8x1xf32>
      %111 = vector.broadcast %108 : vector<8x1xf32> to vector<8x8xf32>
      %112 = arith.subf %103, %111 : vector<8x8xf32>
      %113 = math.exp %112 : vector<8x8xf32>
      %c2_62 = arith.constant 2 : index
      %c0_63 = arith.constant 0 : index
      %c0_64 = arith.constant 0 : index
      %114 = vector.load %arg11[%c2_62, %c0_63, %c0_64] : memref<4x8x1xf32, #tpu.memory_space<vmem>>, vector<1x8x1xf32>
      %115 = vector.shape_cast %114 : vector<1x8x1xf32> to vector<8x1xf32>
      %116 = arith.mulf %110, %115 : vector<8x1xf32>
      %cst_65 = arith.constant dense<0.000000e+00> : vector<8xf32>
      %117 = vector.multi_reduction <add>, %113, %cst_65 [1] : vector<8x8xf32> to vector<8xf32>
      %118 = vector.shape_cast %117 : vector<8xf32> to vector<8x1xf32>
      %119 = arith.addf %116, %118 : vector<8x1xf32>
      %c2_66 = arith.constant 2 : index
      %c0_67 = arith.constant 0 : index
      %c0_68 = arith.constant 0 : index
      %120 = vector.load %arg11[%c2_66, %c0_67, %c0_68] : memref<4x8x1xf32, #tpu.memory_space<vmem>>, vector<1x8x1xf32>
      %121 = vector.shape_cast %120 : vector<1x8x1xf32> to vector<8x1xf32>
      %122 = vector.shape_cast %119 : vector<8x1xf32> to vector<1x8x1xf32>
      tpu.vector_store %arg11[%c2_66, %c0_67, %c0_68], %122 {strides = array<i32>} : memref<4x8x1xf32, #tpu.memory_space<vmem>>, vector<1x8x1xf32>,
      %c2_69 = arith.constant 2 : index
      %c0_70 = arith.constant 0 : index
      %c0_71 = arith.constant 0 : index
      %123 = vector.load %arg9[%c2_69, %c0_70, %c0_71] : memref<4x8x8xf32, #tpu.memory_space<vmem>>, vector<1x8x8xf32>
      %124 = vector.shape_cast %123 : vector<1x8x8xf32> to vector<8x8xf32>
      %125 = vector.broadcast %110 : vector<8x1xf32> to vector<8x8xf32>
      %126 = arith.mulf %125, %124 : vector<8x8xf32>
      %127 = vector.extract_strided_slice %16 {offsets = [0, 48], sizes = [8, 8], strides = [1, 1]} : vector<8x64xf32> to vector<8x8xf32>
      %cst_72 = arith.constant dense<0.000000e+00> : vector<8x8xf32>
      %128 = tpu.matmul %113, %127, %cst_72 {dimension_numbers = #tpu.dot_dimension_numbers<[1], [0], [0], [1], [0, 0, 1, 1], [], []>} : vector<8x8xf32>, vector<8x8xf32>, vector<8x8xf32> -> vector<8x8xf32>
      %129 = arith.addf %126, %128 : vector<8x8xf32>
      %c2_73 = arith.constant 2 : index
      %c0_74 = arith.constant 0 : index
      %c0_75 = arith.constant 0 : index
      %130 = vector.load %arg9[%c2_73, %c0_74, %c0_75] : memref<4x8x8xf32, #tpu.memory_space<vmem>>, vector<1x8x8xf32>
      %131 = vector.shape_cast %130 : vector<1x8x8xf32> to vector<8x8xf32>
      %132 = vector.shape_cast %129 : vector<8x8xf32> to vector<1x8x8xf32>
      tpu.vector_store %arg9[%c2_73, %c0_74, %c0_75], %132 {strides = array<i32>} : memref<4x8x8xf32, #tpu.memory_space<vmem>>, vector<1x8x8xf32>,
      %c2_76 = arith.constant 2 : index
      %c0_77 = arith.constant 0 : index
      %c0_78 = arith.constant 0 : index
      %133 = vector.load %arg10[%c2_76, %c0_77, %c0_78] : memref<4x8x1xf32, #tpu.memory_space<vmem>>, vector<1x8x1xf32>
      %134 = vector.shape_cast %133 : vector<1x8x1xf32> to vector<8x1xf32>
      %135 = vector.shape_cast %108 : vector<8x1xf32> to vector<1x8x1xf32>
      tpu.vector_store %arg10[%c2_76, %c0_77, %c0_78], %135 {strides = array<i32>} : memref<4x8x1xf32, #tpu.memory_space<vmem>>, vector<1x8x1xf32>,
      %136 = vector.extract_strided_slice %27 {offsets = [0, 24], sizes = [8, 8], strides = [1, 1]} : vector<8x32xf32> to vector<8x8xf32>
      %137 = vector.extract_strided_slice %16 {offsets = [0, 24], sizes = [8, 8], strides = [1, 1]} : vector<8x64xf32> to vector<8x8xf32>
      %cst_79 = arith.constant dense<0.000000e+00> : vector<8x8xf32>
      %138 = tpu.matmul %136, %137, %cst_79 {dimension_numbers = #tpu.dot_dimension_numbers<[1], [1], [0], [0], [0, 0, 1, 0], [], []>} : vector<8x8xf32>, vector<8x8xf32>, vector<8x8xf32> -> vector<8x8xf32>
      %139 = arith.addf %138, %26 : vector<8x8xf32>
      %c3 = arith.constant 3 : index
      %c0_80 = arith.constant 0 : index
      %c0_81 = arith.constant 0 : index
      %140 = vector.load %arg10[%c3, %c0_80, %c0_81] : memref<4x8x1xf32, #tpu.memory_space<vmem>>, vector<1x8x1xf32>
      %141 = vector.shape_cast %140 : vector<1x8x1xf32> to vector<8x1xf32>
      %cst_82 = arith.constant dense<0xFF800000> : vector<8xf32>
      %142 = vector.multi_reduction <maximumf>, %139, %cst_82 [1] : vector<8x8xf32> to vector<8xf32>
      %143 = vector.shape_cast %142 : vector<8xf32> to vector<8x1xf32>
      %144 = arith.maximumf %141, %143 : vector<8x1xf32>
      %145 = arith.subf %141, %144 : vector<8x1xf32>
      %146 = math.exp %145 : vector<8x1xf32>
      %147 = vector.broadcast %144 : vector<8x1xf32> to vector<8x8xf32>
      %148 = arith.subf %139, %147 : vector<8x8xf32>
      %149 = math.exp %148 : vector<8x8xf32>
      %c3_83 = arith.constant 3 : index
      %c0_84 = arith.constant 0 : index
      %c0_85 = arith.constant 0 : index
      %150 = vector.load %arg11[%c3_83, %c0_84, %c0_85] : memref<4x8x1xf32, #tpu.memory_space<vmem>>, vector<1x8x1xf32>
      %151 = vector.shape_cast %150 : vector<1x8x1xf32> to vector<8x1xf32>
      %152 = arith.mulf %146, %151 : vector<8x1xf32>
      %cst_86 = arith.constant dense<0.000000e+00> : vector<8xf32>
      %153 = vector.multi_reduction <add>, %149, %cst_86 [1] : vector<8x8xf32> to vector<8xf32>
      %154 = vector.shape_cast %153 : vector<8xf32> to vector<8x1xf32>
      %155 = arith.addf %152, %154 : vector<8x1xf32>
      %c3_87 = arith.constant 3 : index
      %c0_88 = arith.constant 0 : index
      %c0_89 = arith.constant 0 : index
      %156 = vector.load %arg11[%c3_87, %c0_88, %c0_89] : memref<4x8x1xf32, #tpu.memory_space<vmem>>, vector<1x8x1xf32>
      %157 = vector.shape_cast %156 : vector<1x8x1xf32> to vector<8x1xf32>
      %158 = vector.shape_cast %155 : vector<8x1xf32> to vector<1x8x1xf32>
      tpu.vector_store %arg11[%c3_87, %c0_88, %c0_89], %158 {strides = array<i32>} : memref<4x8x1xf32, #tpu.memory_space<vmem>>, vector<1x8x1xf32>,
      %c3_90 = arith.constant 3 : index
      %c0_91 = arith.constant 0 : index
      %c0_92 = arith.constant 0 : index
      %159 = vector.load %arg9[%c3_90, %c0_91, %c0_92] : memref<4x8x8xf32, #tpu.memory_space<vmem>>, vector<1x8x8xf32>
      %160 = vector.shape_cast %159 : vector<1x8x8xf32> to vector<8x8xf32>
      %161 = vector.broadcast %146 : vector<8x1xf32> to vector<8x8xf32>
      %162 = arith.mulf %161, %160 : vector<8x8xf32>
      %163 = vector.extract_strided_slice %16 {offsets = [0, 56], sizes = [8, 8], strides = [1, 1]} : vector<8x64xf32> to vector<8x8xf32>
      %cst_93 = arith.constant dense<0.000000e+00> : vector<8x8xf32>
      %164 = tpu.matmul %149, %163, %cst_93 {dimension_numbers = #tpu.dot_dimension_numbers<[1], [0], [0], [1], [0, 0, 1, 1], [], []>} : vector<8x8xf32>, vector<8x8xf32>, vector<8x8xf32> -> vector<8x8xf32>
      %165 = arith.addf %162, %164 : vector<8x8xf32>
      %c3_94 = arith.constant 3 : index
      %c0_95 = arith.constant 0 : index
      %c0_96 = arith.constant 0 : index
      %166 = vector.load %arg9[%c3_94, %c0_95, %c0_96] : memref<4x8x8xf32, #tpu.memory_space<vmem>>, vector<1x8x8xf32>
      %167 = vector.shape_cast %166 : vector<1x8x8xf32> to vector<8x8xf32>
      %168 = vector.shape_cast %165 : vector<8x8xf32> to vector<1x8x8xf32>
      tpu.vector_store %arg9[%c3_94, %c0_95, %c0_96], %168 {strides = array<i32>} : memref<4x8x8xf32, #tpu.memory_space<vmem>>, vector<1x8x8xf32>,
      %c3_97 = arith.constant 3 : index
      %c0_98 = arith.constant 0 : index
      %c0_99 = arith.constant 0 : index
      %169 = vector.load %arg10[%c3_97, %c0_98, %c0_99] : memref<4x8x1xf32, #tpu.memory_space<vmem>>, vector<1x8x1xf32>
      %170 = vector.shape_cast %169 : vector<1x8x1xf32> to vector<8x1xf32>
      %171 = vector.shape_cast %144 : vector<8x1xf32> to vector<1x8x1xf32>
      tpu.vector_store %arg10[%c3_97, %c0_98, %c0_99], %171 {strides = array<i32>} : memref<4x8x1xf32, #tpu.memory_space<vmem>>, vector<1x8x1xf32>,
      %c0_100 = arith.constant 0 : index
      %c0_101 = arith.constant 0 : index
      %c0_102 = arith.constant 0 : index
      %172 = vector.load %arg11[%c0_100, %c0_101, %c0_102] : memref<4x8x1xf32, #tpu.memory_space<vmem>>, vector<1x8x1xf32>
      %173 = vector.shape_cast %172 : vector<1x8x1xf32> to vector<8x1xf32>
      %174 = tpu.reciprocal %173 {approx = true} : vector<8x1xf32> -> vector<8x1xf32>
      %c0_103 = arith.constant 0 : index
      %c0_104 = arith.constant 0 : index
      %c0_105 = arith.constant 0 : index
      %175 = vector.load %arg9[%c0_103, %c0_104, %c0_105] : memref<4x8x8xf32, #tpu.memory_space<vmem>>, vector<1x8x8xf32>
      %176 = vector.shape_cast %175 : vector<1x8x8xf32> to vector<8x8xf32>
      %177 = vector.broadcast %174 : vector<8x1xf32> to vector<8x8xf32>
      %178 = arith.mulf %176, %177 : vector<8x8xf32>
      %c1_106 = arith.constant 1 : index
      %c0_107 = arith.constant 0 : index
      %c0_108 = arith.constant 0 : index
      %179 = vector.load %arg11[%c1_106, %c0_107, %c0_108] : memref<4x8x1xf32, #tpu.memory_space<vmem>>, vector<1x8x1xf32>
      %180 = vector.shape_cast %179 : vector<1x8x1xf32> to vector<8x1xf32>
      %181 = tpu.reciprocal %180 {approx = true} : vector<8x1xf32> -> vector<8x1xf32>
      %c1_109 = arith.constant 1 : index
      %c0_110 = arith.constant 0 : index
      %c0_111 = arith.constant 0 : index
      %182 = vector.load %arg9[%c1_109, %c0_110, %c0_111] : memref<4x8x8xf32, #tpu.memory_space<vmem>>, vector<1x8x8xf32>
      %183 = vector.shape_cast %182 : vector<1x8x8xf32> to vector<8x8xf32>
      %184 = vector.broadcast %181 : vector<8x1xf32> to vector<8x8xf32>
      %185 = arith.mulf %183, %184 : vector<8x8xf32>
      %c2_112 = arith.constant 2 : index
      %c0_113 = arith.constant 0 : index
      %c0_114 = arith.constant 0 : index
      %186 = vector.load %arg11[%c2_112, %c0_113, %c0_114] : memref<4x8x1xf32, #tpu.memory_space<vmem>>, vector<1x8x1xf32>
      %187 = vector.shape_cast %186 : vector<1x8x1xf32> to vector<8x1xf32>
      %188 = tpu.reciprocal %187 {approx = true} : vector<8x1xf32> -> vector<8x1xf32>
      %c2_115 = arith.constant 2 : index
      %c0_116 = arith.constant 0 : index
      %c0_117 = arith.constant 0 : index
      %189 = vector.load %arg9[%c2_115, %c0_116, %c0_117] : memref<4x8x8xf32, #tpu.memory_space<vmem>>, vector<1x8x8xf32>
      %190 = vector.shape_cast %189 : vector<1x8x8xf32> to vector<8x8xf32>
      %191 = vector.broadcast %188 : vector<8x1xf32> to vector<8x8xf32>
      %192 = arith.mulf %190, %191 : vector<8x8xf32>
      %c3_118 = arith.constant 3 : index
      %c0_119 = arith.constant 0 : index
      %c0_120 = arith.constant 0 : index
      %193 = vector.load %arg11[%c3_118, %c0_119, %c0_120] : memref<4x8x1xf32, #tpu.memory_space<vmem>>, vector<1x8x1xf32>
      %194 = vector.shape_cast %193 : vector<1x8x1xf32> to vector<8x1xf32>
      %195 = tpu.reciprocal %194 {approx = true} : vector<8x1xf32> -> vector<8x1xf32>
      %c3_121 = arith.constant 3 : index
      %c0_122 = arith.constant 0 : index
      %c0_123 = arith.constant 0 : index
      %196 = vector.load %arg9[%c3_121, %c0_122, %c0_123] : memref<4x8x8xf32, #tpu.memory_space<vmem>>, vector<1x8x8xf32>
      %197 = vector.shape_cast %196 : vector<1x8x8xf32> to vector<8x8xf32>
      %198 = vector.broadcast %195 : vector<8x1xf32> to vector<8x8xf32>
      %199 = arith.mulf %197, %198 : vector<8x8xf32>
      %200 = tpu.concatenate %178, %185, %192, %199 in 1 : vector<8x8xf32>, vector<8x8xf32>, vector<8x8xf32>, vector<8x8xf32> -> vector<8x32xf32>
      %c0_124 = arith.constant 0 : index
      %c0_125 = arith.constant 0 : index
      %201 = vector.load %arg6[%c0_124, %c0_125] : memref<8x32xf32, #tpu.memory_space<vmem>>, vector<8x32xf32>
      tpu.vector_store %arg6[%c0_124, %c0_125], %200 {strides = array<i32>} : memref<8x32xf32, #tpu.memory_space<vmem>>, vector<8x32xf32>,
    } else {
    }
    return
  }
  func.func @transform_0(%arg0: i32, %arg1: i32, %arg2: i32) -> (i32, i32) {
    %c0_i32 = arith.constant 0 : i32
    %c0_i32_0 = arith.constant 0 : i32
    return %arg1, %c0_i32 : i32, i32
  }
  func.func @transform_1(%arg0: i32, %arg1: i32, %arg2: i32) -> (i32, i32, i32) {
    %c0_i32 = arith.constant 0 : i32
    %c0_i32_0 = arith.constant 0 : i32
    %c0_i32_1 = arith.constant 0 : i32
    return %arg0, %c0_i32, %c0_i32_0 : i32, i32, i32
  }
  func.func @transform_2(%arg0: i32, %arg1: i32, %arg2: i32) -> (i32, i32, i32) {
    %c0_i32 = arith.constant 0 : i32
    %c0_i32_0 = arith.constant 0 : i32
    %c0_i32_1 = arith.constant 0 : i32
    return %arg0, %c0_i32, %c0_i32_0 : i32, i32, i32
  }
  func.func @transform_3(%arg0: i32, %arg1: i32, %arg2: i32) -> (i32, i32) {
    %c0_i32 = arith.constant 0 : i32
    return %arg1, %arg0 : i32, i32
  }
}

</mosaic_0001>

<bundles_post_ra>
// kernel: tpu_custom_call.1
= control target key start
LH: loop header
LB: loop body
LE: loop exit
PB: predicated region body
PF: predicated region fallthrough
CT: control target
= control target key end

     0   :  { %8 = vsyncpa [#allocation8], 0  ;;  %s2337_s0 = inlined_call_operand.hbm [shape: f32[8,32], index: 0, kind: input, shape index: {}]   ;;  %s2338_s1 = inlined_call_operand.hbm [shape: f32[1,32,96], index: 1, kind: input, shape index: {}]   ;;  %s2339_s2 = inlined_call_operand.vmem [shape: f32[1,1,96], index: 2, kind: input, shape index: {}]   ;;  %s2340_s3 = inlined_call_operand.hbm [shape: f32[8,32], index: 3, kind: output, shape index: {}]  }
   0x1   :  { %9 = vsyncpa [#allocation11], 0 }
   0x2   :  { %10 = vsyncpa [#allocation9], 0  ;;  %s2113_s12 = smov [#allocation7]   ;;  %s2114_s14 = smov [#allocation10]  }
   0x3   :  { %s17_s13 = sshll.u32 %s2113_s12, 4  ;;  %s26_s15 = sshll.u32 %s2114_s14, 4  ;;  %s18_s13 = int_to_ptr.vmem [resolvable:$true] %s17_s13  ;;  %s2152_s15 = int_to_ptr.vmem [resolvable:$true] %s26_s15 }
   0x4   :  { %s2041_s18 = scalar_lea.hbm %s2337_s0, 128 }
   0x5   :  { %p2042_p0 = scmp.ne.s32.totalorder %s2337_s0, %s2041_s18  ;;  %p2045_p1 = scmp.lt.u32.totalorder %s2041_s18, %s2337_s0 }
   0x7   :  { %p2047_p2 = pnand %p2045_p1, %p2042_p0 }
   0x9   :  { %2050 = shalt.err (!%p2047_p2)
}
   0xa   :  { %s2051_s23 = scalar_lea.vmem %s18_s13, 128  ;;  %p2056_p4 = scmp.lt.s32.totalorder %s18_s13, %s18_s13 }
   0xb   :  { %p2052_p3 = scmp.ne.s32.totalorder %s18_s13, %s2051_s23  ;;  %p2057_p5 = scmp.lt.s32.totalorder %s2051_s23, %s2051_s23 }
   0xd   :  { %p2058_p6 = por %p2057_p5, %p2056_p4 }
   0xf   :  { %p2059_p7 = pnand %p2058_p6, %p2052_p3 }
  0x11   :  { %2062 = shalt.err (!%p2059_p7)
}
  0x12   :  { %20 = dma.hbm_to_vmem [thread:$0]  %s2337_s0, 128, %s18_s13, [#allocation8]  }
  0x13   :  { %s2063_s28 = scalar_lea.hbm %s2338_s1, 512 }
  0x14   :  { %p2064_p8 = scmp.ne.s32.totalorder %s2338_s1, %s2063_s28  ;;  %p2067_p9 = scmp.lt.u32.totalorder %s2063_s28, %s2338_s1 }
  0x16   :  { %p2069_p10 = pnand %p2067_p9, %p2064_p8 }
  0x18   :  { %2072 = shalt.err (!%p2069_p10)
}
  0x19   :  { %s2073_s6 = scalar_lea.vmem %s2152_s15, 512  ;;  %p2078_p12 = scmp.lt.s32.totalorder %s2152_s15, %s2152_s15 }
  0x1a   :  { %p2074_p11 = scmp.ne.s32.totalorder %s2152_s15, %s2073_s6  ;;  %p2079_p13 = scmp.lt.s32.totalorder %s2073_s6, %s2073_s6 }
  0x1c   :  { %p2080_p0 = por %p2079_p13, %p2078_p12 }
  0x1e   :  { %p2081_p1 = pnand %p2080_p0, %p2074_p11 }
  0x20   :  { %2084 = shalt.err (!%p2081_p1)
}
  0x21   :  { %s2115_s0 = smov 128   ;;  %s2116_s7 = smov 8  }
  0x22   :  { %32 = dma.hbm_to_vmem [thread:$0]  %s2338_s1, 512, %s2152_s15, [#allocation11], %s2115_s0, %s2115_s0, %s2116_s7  }
  0x23   :  { %2107 = dma.done.wait [#allocation8], 128  }
  0x24   :  { %2108 = vsyncadd [#allocation8], 4294967168 }
  0x25   :  { %2109 = dma.done.wait [#allocation11], 512  }
  0x26   :  { %2110 = vsyncadd [#allocation11], 4294966784  ;;  %v2117_v0 = vmov 0.0|0.0   ;;  %vm2118_vm0 = vmmov 0   ;;  %v2119_v1 = vmov 0.0   ;;  %v917_v2 = vld [vmem:[#allocation10] sm:$0xff]  ;;  %v1024_v35 = vlaneseq }
  0x27   :  { %1974 = vmatprep.subr.bf16.mxu0 %v2117_v0  ;;  %1920 = vmatprep.mubr.msk.f32.mxu0 %vm2118_vm0, %v2119_v1  ;;  %v918_v3 = vld [vmem:[#allocation10 + $0x8] sm:$0xff]  ;;  %v919_v4 = vld [vmem:[#allocation10 + $0x10] sm:$0xff]  ;;  %v920_v6 = vld [vmem:[#allocation10 + $0x18] sm:$0xff]  ;;  %s2120_s11 = smov 96   ;;  %vm57_vm1 = vcmask 261120   ;;  %vm133_vm2 = vcmask 64512  }
  0x28   :  { %1980 = vmatprep.subr.bf16.mxu1 %v2117_v0  ;;  %1931 = vmatprep.mubr.msk.f32.mxu1 %vm2118_vm0, %v2119_v1  ;;  %v2005_v5 = vpack.i.bf16 %v918_v3, %v917_v2  ;;  %v1975_v7 = vpack.c.bf16 %v918_v3, %v917_v2  ;;  %v1872_v8 = vld [vmem:[%s2339_s2] ss:$0 sm:$0xff]  ;;  %v2010_v9 = vpack.i.bf16 %v920_v6, %v919_v4  ;;  %v45_v11 = vld [vmem:[#allocation7] sm:$0xff]  ;;  %s2121_s2 = smov 120   ;;  %s2122_s12 = smov 112   ;;  %v1025_v36 = vshrl.u32 %v1024_v35, 7 }
  0x29   :  { %943 = vrot.lane.b32.xlu1 %v1872_v8, %s2120_s11  ;;  %v1978_v10 = vpack.c.bf16 %v920_v6, %v919_v4  ;;  %134 = vst.msk [vmem:[#allocation4] sm:$0xff] %vm133_vm2, %v2119_v1  ;;  %135 = vst.msk [vmem:[#allocation4 + $0x8] sm:$0xff] %vm133_vm2, %v2119_v1  ;;  %s2123_s13 = smov 104   ;;  %v1027_v37 = vand.u32 127, %v1024_v35  ;;  %vm138_vm4 = vcmask 7168   ;;  %v2124_v40 = vmov -inf  }
  0x2a   :  { %2006 = vrot.lane.b32.xlu0 %v2005_v5, %s2120_s11  ;;  %1976 = vmatpush3.bf16.msra.mxu0 %v1975_v7  ;;  %136 = vst.msk [vmem:[#allocation4 + $0x10] sm:$0xff] %vm133_vm2, %v2119_v1  ;;  %137 = vst.msk [vmem:[#allocation4 + $0x18] sm:$0xff] %vm133_vm2, %v2119_v1  ;;  %v2125_v44 = vmov 0   ;;  %s2126_s14 = smov 88   ;;  %s2127_s15 = smov 80   ;;  %vm1837_vm5 = vcmask 130048  }
  0x2b   :  { %1977 = vmatprep.subr.bf16.mxu0 %v2117_v0  ;;  %vm1028_vm3 = vcmp.gt.s32.totalorder %v1027_v37, %v1025_v36  ;;  %139 = vst.msk [vmem:[#allocation5] sm:$0xff] %vm138_vm4, %v2124_v40  ;;  %140 = vst.msk [vmem:[#allocation5 + $0x8] sm:$0xff] %vm138_vm4, %v2124_v40  ;;  %2015 = vset.pattern.permute.xlu0 %v2125_v44  ;;  %s2128_s16 = smov 72   ;;  %s2129_s17 = smov 16   ;;  %vm1839_vm6 = vcmask 195584  }
  0x2c   :  { %v1029_v38 = vsel %vm1028_vm3, -1e+09, %v2119_v1  ;;  %141 = vst.msk [vmem:[#allocation5 + $0x10] sm:$0xff] %vm138_vm4, %v2124_v40  ;;  %142 = vst.msk [vmem:[#allocation5 + $0x18] sm:$0xff] %vm138_vm4, %v2124_v40  ;;  %2016 = vset.pattern.permute.xlu1 %v2125_v44  ;;  %s2130_s18 = smov 24   ;;  %s2131_s19 = smov [#allocation12]  }
  0x2d   :  { %143 = vst.msk [vmem:[#allocation6] sm:$0xff] %vm138_vm4, %v2119_v1  ;;  %144 = vst.msk [vmem:[#allocation6 + $0x8] sm:$0xff] %vm138_vm4, %v2119_v1  ;;  %s1848_s20 = sshll.u32 %s2131_s19, 4  ;;  %s1849_s20 = int_to_ptr.vmem [resolvable:$true] %s1848_s20 }
  0x2e   :  { %2011 = vrot.lane.b32.xlu0 %v2010_v9, %s2120_s11  ;;  %1979 = vmatpush3.bf16.msra.mxu0 %v1978_v10  ;;  %145 = vst.msk [vmem:[#allocation6 + $0x10] sm:$0xff] %vm138_vm4, %v2119_v1  ;;  %146 = vst.msk [vmem:[#allocation6 + $0x18] sm:$0xff] %vm138_vm4, %v2119_v1  ;;  %s2085_s21 = scalar_lea.vmem %s1849_s20, 128  ;;  %p2090_p3 = scmp.lt.s32.totalorder %s1849_s20, %s1849_s20 }
  0x2f   :  { %1934 = vmatprep.subr.mxu0 %v2119_v1  ;;  %p2086_p2 = scmp.ne.s32.totalorder %s1849_s20, %s2085_s21  ;;  %p2091_p4 = scmp.lt.s32.totalorder %s2085_s21, %s2085_s21 }
  0x31   :  { %1921 = vmatmul.mubr.msk.f32.vlgmr.msra.gmra.mrb[0].mxu0 %vm57_vm1, %v45_v11  ;;  %p2092_p5 = por %p2091_p4, %p2090_p3 }
  0x32   :  { %1936 = vmatprep.mubr.msk.f32.mxu0 %vm2118_vm0, %v2119_v1  ;;  %v2251_v57 = vld [vmem:[#allocation5] sm:$0xff]  ;;  %v2261_v61 = vld [vmem:[#allocation5 + $0x8] sm:$0xff] }
  0x33   :  { %v2276_v5 = vld [vmem:[#allocation5 + $0x18] sm:$0xff]  ;;  %p2093_p6 = pnand %p2092_p5, %p2086_p2 }
  0x9b   :  { %v944_v25 = vpop.permute.xlu1 %943 }
  0x9c   :  { %v2007_v12 = vpop.permute.xlu0 %2006 }
  0x9d   :  { %v2009_v13 = vunpack.i.h.bf16 %v2007_v12  ;;  %v2008_v14 = vunpack.i.l.bf16 %v2007_v12 }
  0x9f   :  { %v1981_v15 = vpack.c.bf16 %v2009_v13, %v2008_v14 }
  0xa0   :  { %v2012_v16 = vpop.permute.xlu0 %2011 }
  0xa1   :  { %v2014_v17 = vunpack.i.h.bf16 %v2012_v16  ;;  %v2013_v18 = vunpack.i.l.bf16 %v2012_v16  ;;  %1982 = vmatpush3.bf16.msra.mxu1 %v1981_v15 }
  0xa2   :  { %1983 = vmatprep.subr.bf16.mxu1 %v2117_v0  ;;  %v2266_v0 = vld [vmem:[#allocation5 + $0x10] sm:$0xff] }
  0xa3   :  { %v1984_v19 = vpack.c.bf16 %v2014_v17, %v2013_v18 }
  0xa5   :  { %1985 = vmatpush3.bf16.msra.mxu1 %v1984_v19 }
  0xa6   :  { %1939 = vmatprep.subr.mxu1 %v2119_v1 }
  0xa8   :  { %1932 = vmatmul.mubr.msk.f32.vlgmr.msra.gmra.mrb[0].mxu1 %vm57_vm1, %v45_v11 }
  0xa9   :  { %1941 = vmatprep.mubr.msk.f32.mxu1 %vm2118_vm0, %v2119_v1 }
 0x104   :  { %v127_v20 = vpop.f32.mrb[0].mxu0 }
 0x105   :  { %v128_v21 = vadd.f32 %v1872_v8, %v127_v20  ;;  %v1922_v22 = vpop.f32.mrb[1].mxu0 }
 0x107   :  { %v131_v23 = vmul.f32 0.35355338, %v128_v21 }
 0x109   :  { %132 = vst.msk [vmem:[#allocation2] sm:$0xff] %vm57_vm1, %v131_v23 }
 0x110   :  { %v1030_v24 = vld [vmem:[#allocation2] sm:$0xff] }
 0x111   :  { %1218 = vrot.lane.b32.xlu0 %v1030_v24, %s2121_s2 }
 0x115   :  { %1408 = vrot.lane.b32.xlu0 %v1030_v24, %s2122_s12 }
 0x119   :  { %1598 = vrot.lane.b32.xlu0 %v1030_v24, %s2123_s13 }
 0x17b   :  { %v1016_v26 = vpop.f32.mrb[0].mxu1 }
 0x17c   :  { %v2211_v27 = vadd.f32 %v1016_v26, %v944_v25  ;;  %v1933_v28 = vpop.f32.mrb[1].mxu1 }
 0x17e   :  { %1220 = vrot.lane.b32.xlu1 %v2211_v27, %s2121_s2  ;;  %1935 = vmatpush3.xpose.msk.msra.mxu0 %vm133_vm2, %v2211_v27 }
 0x17f   :  { %1944 = vmatprep.subr.mxu0 %v2119_v1 }
 0x181   :  { %1937 = vmatmul.mubr.msk.f32.vlgmr.msra.gmra.mrb[2].mxu0 %vm133_vm2, %v1030_v24 }
 0x182   :  { %1410 = vrot.lane.b32.xlu1 %v2211_v27, %s2122_s12  ;;  %1946 = vmatprep.mubr.msk.f32.mxu0 %vm2118_vm0, %v2119_v1 }
 0x183   :  { %v1219_v29 = vpop.permute.xlu0 %1218 }
 0x186   :  { %1600 = vrot.lane.b32.xlu1 %v2211_v27, %s2123_s13 }
 0x187   :  { %v1409_v32 = vpop.permute.xlu0 %1408 }
 0x18b   :  { %v1599_v34 = vpop.permute.xlu0 %1598 }
 0x1f0   :  { %v1221_v30 = vpop.permute.xlu1 %1220 }
 0x1f1   :  { %1945 = vmatpush3.xpose.msk.msra.mxu0 %vm133_vm2, %v1221_v30 }
 0x1f2   :  { %1954 = vmatprep.subr.mxu0 %v2119_v1 }
 0x1f4   :  { %v1411_v31 = vpop.permute.xlu1 %1410  ;;  %1947 = vmatmul.mubr.msk.f32.vlgmr.msra.gmra.mrb[4].mxu0 %vm133_vm2, %v1219_v29 }
 0x1f5   :  { %1955 = vmatpush3.xpose.msk.msra.mxu0 %vm133_vm2, %v1411_v31  ;;  %1956 = vmatprep.mubr.msk.f32.mxu0 %vm2118_vm0, %v2119_v1 }
 0x1f6   :  { %1964 = vmatprep.subr.mxu0 %v2119_v1 }
 0x1f8   :  { %v1601_v33 = vpop.permute.xlu1 %1600  ;;  %1957 = vmatmul.mubr.msk.f32.vlgmr.msra.gmra.mrb[6].mxu0 %vm133_vm2, %v1409_v32 }
 0x1f9   :  { %1965 = vmatpush3.xpose.msk.msra.mxu0 %vm133_vm2, %v1601_v33  ;;  %1966 = vmatprep.mubr.msk.f32.mxu0 %vm2118_vm0, %v2119_v1 }
 0x1fc   :  { %1967 = vmatmul.mubr.msk.f32.vlgmr.msra.gmra.mrb[8].mxu0 %vm133_vm2, %v1599_v34 }
 0x254   :  { %v1104_v39 = vpop.f32.mrb[2].mxu0 }
 0x255   :  { %v1105_v41 = vadd.f32 %v1104_v39, %v1029_v38  ;;  %v1938_v42 = vpop.f32.mrb[3].mxu0 }
 0x257   :  { %v1109_v43 = vsel %vm133_vm2, %v1105_v41, -inf }
 0x258   :  { %1110 = vmax.xlane.f32.xlu1 %v1109_v43 }
 0x2c7   :  { %v1292_v45 = vpop.f32.mrb[4].mxu0 }
 0x2c8   :  { %v1293_v46 = vadd.f32 %v1292_v45, %v1029_v38  ;;  %v1948_v47 = vpop.f32.mrb[5].mxu0 }
 0x2c9   :  { %v1314_v47 = vld [vmem:[#allocation6 + $0x8] sm:$0xff] }
 0x2ca   :  { %v1298_v48 = vsel %vm133_vm2, %v1293_v46, -inf }
 0x2cb   :  { %1299 = vmax.xlane.f32.xlu0 %v1298_v48  ;;  %v1482_v49 = vpop.f32.mrb[6].mxu0 }
 0x2cc   :  { %v1483_v50 = vadd.f32 %v1482_v49, %v1029_v38  ;;  %v1958_v51 = vpop.f32.mrb[7].mxu0 }
 0x2ce   :  { %v1488_v52 = vsel %vm133_vm2, %v1483_v50, -inf }
 0x2cf   :  { %1489 = vmax.xlane.f32.xlu0 %v1488_v52  ;;  %v1672_v53 = vpop.f32.mrb[8].mxu0 }
 0x2d0   :  { %v1673_v54 = vadd.f32 %v1672_v53, %v1029_v38  ;;  %v1968_v55 = vpop.f32.mrb[9].mxu0 }
 0x2d2   :  { %v1678_v56 = vsel %vm133_vm2, %v1673_v54, -inf }
 0x2d3   :  { %1679 = vmax.xlane.f32.xlu1 %v1678_v56 }
 0x2e5   :  { %v1111_v58 = vpop.xlane.xlu1 %1110 }
 0x2e6   :  { %v2254_v59 = vmax.f32 %v2251_v57, %v1111_v58 }
 0x2e8   :  { %v1113_v60 = vsub.f32 %v2251_v57, %v2254_v59  ;;  %1217 = vst.msk [vmem:[#allocation5] sm:$0xff] %vm138_vm4, %v2254_v59  ;;  %1118 = vperm.xlu0 %2015, %v2254_v59  }
 0x2ea   :  { %v1114_v36 = vmul.f32 1.442695, %v1113_v60 }
 0x358   :  { %v1300_v62 = vpop.xlane.xlu0 %1299 }
 0x359   :  { %v2264_v63 = vmax.f32 %v2261_v61, %v1300_v62 }
 0x35b   :  { %v1302_v2 = vsub.f32 %v2261_v61, %v2264_v63  ;;  %1407 = vst.msk [vmem:[#allocation5 + $0x8] sm:$0xff] %vm138_vm4, %v2264_v63  ;;  %1307 = vperm.xlu1 %2016, %v2264_v63  }
 0x35c   :  { %v1490_v3 = vpop.xlane.xlu0 %1489 }
 0x35d   :  { %v2274_v4 = vmax.f32 %v2266_v0, %v1490_v3  ;;  %v1303_v32 = vmul.f32 1.442695, %v1302_v2  ;;  %v1132_v2 = vld [vmem:[#allocation4] sm:$0xff] }
 0x35f   :  { %v1492_v6 = vsub.f32 %v2266_v0, %v2274_v4  ;;  %1597 = vst.msk [vmem:[#allocation5 + $0x10] sm:$0xff] %vm138_vm4, %v2274_v4  ;;  %1497 = vperm.xlu1 %2016, %v2274_v4  }
 0x360   :  { %v1680_v7 = vpop.xlane.xlu1 %1679 }
 0x361   :  { %v1681_v8 = vmax.f32 %v2276_v5, %v1680_v7  ;;  %v1493_v37 = vmul.f32 1.442695, %v1492_v6 }
 0x363   :  { %v1682_v9 = vsub.f32 %v2276_v5, %v1681_v8  ;;  %1787 = vst.msk [vmem:[#allocation5 + $0x18] sm:$0xff] %vm138_vm4, %v1681_v8  ;;  %1687 = vperm.xlu1 %2016, %v1681_v8   ;;  %v1322_v5 = vld [vmem:[#allocation4 + $0x8] sm:$0xff] }
 0x365   :  { %v1683_v35 = vmul.f32 1.442695, %v1682_v9 }
 0x367   :  { %1139 = vrot.lane.b32.xlu1 %v2211_v27, %s2120_s11  ;;  %v1119_v10 = vpop.permute.xlu0 %1118 }
 0x368   :  { %v1121_v11 = vsub.f32 %v1105_v41, %v1119_v10  ;;  %v1124_v41 = vld [vmem:[#allocation6] sm:$0xff] }
 0x36a   :  { %v1122_v12 = vmul.f32 1.442695, %v1121_v11  ;;  %v1512_v11 = vld [vmem:[#allocation4 + $0x10] sm:$0xff] }
 0x36b   :  { %1329 = vrot.lane.b32.xlu1 %v2211_v27, %s2126_s14 }
 0x36c   :  { %2017 = vpow2.f32 %v1122_v12 }
 0x36f   :  { %1519 = vrot.lane.b32.xlu1 %v2211_v27, %s2127_s15 }
 0x373   :  { %1709 = vrot.lane.b32.xlu1 %v2211_v27, %s2128_s16 }
 0x376   :  { %v2018_v13 = vpop.eup %2017 }
 0x377   :  { %v1126_v14 = vsel %vm133_vm2, %v2018_v13, 0.0 }
 0x397   :  { %1127 = vadd.xlane.f32.xlu1 %v1126_v14 }
 0x3da   :  { %v1308_v15 = vpop.permute.xlu1 %1307 }
 0x3db   :  { %v1310_v16 = vsub.f32 %v1293_v46, %v1308_v15 }
 0x3dd   :  { %v1311_v17 = vmul.f32 1.442695, %v1310_v16 }
 0x3de   :  { %v1498_v18 = vpop.permute.xlu1 %1497 }
 0x3df   :  { %2019 = vpow2.f32 %v1311_v17  ;;  %v1500_v19 = vsub.f32 %v1483_v50, %v1498_v18  ;;  %v1504_v50 = vld [vmem:[#allocation6 + $0x10] sm:$0xff]  ;;  %v1702_v17 = vld [vmem:[#allocation4 + $0x18] sm:$0xff] }
 0x3e1   :  { %v1501_v20 = vmul.f32 1.442695, %v1500_v19 }
 0x3e2   :  { %v1688_v21 = vpop.permute.xlu1 %1687 }
 0x3e3   :  { %2021 = vpow2.f32 %v1501_v20  ;;  %v1690_v22 = vsub.f32 %v1673_v54, %v1688_v21  ;;  %v1694_v54 = vld [vmem:[#allocation6 + $0x18] sm:$0xff] }
 0x3e5   :  { %v1691_v23 = vmul.f32 1.442695, %v1690_v22 }
 0x3e6   :  { %v1140_v24 = vpop.permute.xlu1 %1139 }
 0x3e7   :  { %2023 = vpow2.f32 %v1691_v23  ;;  %1940 = vmatpush3.msra.mxu1 %v1140_v24 }
 0x3e8   :  { %1942 = vmatmul.mubr.msk.f32.vlgmr.msra.gmra.mrb[2].mxu1 %vm133_vm2, %v2018_v13  ;;  %1949 = vmatprep.subr.mxu1 %v2119_v1  ;;  %2025 = vpow2.f32 %v1303_v32 }
 0x3e9   :  { %v2020_v25 = vpop.eup %2019  ;;  %1951 = vmatprep.mubr.msk.f32.mxu1 %vm2118_vm0, %v2119_v1  ;;  %2027 = vpow2.f32 %v1683_v35 }
 0x3ea   :  { %v1330_v26 = vpop.permute.xlu1 %1329  ;;  %v1316_v27 = vsel %vm133_vm2, %v2020_v25, 0.0  ;;  %2029 = vpow2.f32 %v1114_v36 }
 0x3eb   :  { %1317 = vadd.xlane.f32.xlu0 %v1316_v27  ;;  %1950 = vmatpush3.msra.mxu1 %v1330_v26  ;;  %2031 = vpow2.f32 %v1493_v37 }
 0x3ec   :  { %1952 = vmatmul.mubr.msk.f32.vlgmr.msra.gmra.mrb[4].mxu1 %vm133_vm2, %v2020_v25  ;;  %1959 = vmatprep.subr.mxu1 %v2119_v1 }
 0x3ed   :  { %v2022_v28 = vpop.eup %2021  ;;  %1961 = vmatprep.mubr.msk.f32.mxu1 %vm2118_vm0, %v2119_v1 }
 0x3ee   :  { %v1520_v29 = vpop.permute.xlu1 %1519  ;;  %v1506_v30 = vsel %vm133_vm2, %v2022_v28, 0.0 }
 0x3ef   :  { %1507 = vadd.xlane.f32.xlu1 %v1506_v30  ;;  %1960 = vmatpush3.msra.mxu1 %v1520_v29 }
 0x3f0   :  { %1962 = vmatmul.mubr.msk.f32.vlgmr.msra.gmra.mrb[6].mxu1 %vm133_vm2, %v2022_v28  ;;  %1969 = vmatprep.subr.mxu1 %v2119_v1 }
 0x3f1   :  { %v2024_v31 = vpop.eup %2023  ;;  %1971 = vmatprep.mubr.msk.f32.mxu1 %vm2118_vm0, %v2119_v1 }
 0x3f2   :  { %v1710_v33 = vpop.permute.xlu1 %1709  ;;  %v1696_v34 = vsel %vm133_vm2, %v2024_v31, 0.0  ;;  %v2026_v1 = vpop.eup %2025 }
 0x3f3   :  { %1697 = vadd.xlane.f32.xlu0 %v1696_v34  ;;  %1970 = vmatpush3.msra.mxu1 %v1710_v33  ;;  %v2028_v38 = vpop.eup %2027  ;;  %v1315_v48 = vmul.f32 %v2026_v1, %v1314_v47 }
 0x3f4   :  { %1972 = vmatmul.mubr.msk.f32.vlgmr.msra.gmra.mrb[8].mxu1 %vm133_vm2, %v2024_v31  ;;  %v2030_v39 = vpop.eup %2029  ;;  %v1695_v56 = vmul.f32 %v2028_v38, %v1694_v54 }
 0x3f5   :  { %v2032_v40 = vpop.eup %2031  ;;  %v1125_v42 = vmul.f32 %v2030_v39, %v1124_v41 }
 0x3f6   :  { %v1505_v52 = vmul.f32 %v2032_v40, %v1504_v50 }
 0x400   :  { %1325 = vperm.xlu1 %2016, %v2026_v1  }
 0x404   :  { %1705 = vperm.xlu1 %2016, %v2028_v38  }
 0x409   :  { %1135 = vperm.xlu0 %2015, %v2030_v39  }
 0x40d   :  { %1515 = vperm.xlu0 %2015, %v2032_v40  }
 0x424   :  { %v1128_v43 = vpop.xlane.xlu1 %1127 }
 0x425   :  { %v1129_v44 = vadd.f32 %v1128_v43, %v1125_v42 }
 0x427   :  { %1131 = vst.msk [vmem:[#allocation6] sm:$0xff] %vm138_vm4, %v1129_v44 }
 0x42e   :  { %v1788_v45 = vld [vmem:[#allocation6] sm:$0xff] }
 0x42f   :  { %2033 = vrcp.f32 %v1788_v45 }
 0x439   :  { %v2034_v46 = vpop.eup %2033 }
 0x43a   :  { %1793 = vperm.xlu1 %2016, %v2034_v46  }
 0x478   :  { %v1318_v49 = vpop.xlane.xlu0 %1317 }
 0x479   :  { %v1319_v51 = vadd.f32 %v1318_v49, %v1315_v48 }
 0x47b   :  { %1320 = vst.msk [vmem:[#allocation6 + $0x8] sm:$0xff] %vm138_vm4, %v1319_v51 }
 0x47c   :  { %v1508_v53 = vpop.xlane.xlu1 %1507 }
 0x47d   :  { %v1509_v55 = vadd.f32 %v1508_v53, %v1505_v52 }
 0x47f   :  { %1510 = vst.msk [vmem:[#allocation6 + $0x10] sm:$0xff] %vm138_vm4, %v1509_v55 }
 0x480   :  { %v1698_v57 = vpop.xlane.xlu0 %1697  ;;  %v1326_v6 = vpop.permute.xlu1 %1325 }
 0x481   :  { %v1699_v58 = vadd.f32 %v1698_v57, %v1695_v56  ;;  %v1328_v10 = vmul.f32 %v1326_v6, %v1322_v5 }
 0x482   :  { %v1797_v59 = vld [vmem:[#allocation6 + $0x8] sm:$0xff] }
 0x483   :  { %1700 = vst.msk [vmem:[#allocation6 + $0x18] sm:$0xff] %vm138_vm4, %v1699_v58  ;;  %2035 = vrcp.f32 %v1797_v59 }
 0x484   :  { %v1706_v18 = vpop.permute.xlu1 %1705 }
 0x485   :  { %v1708_v22 = vmul.f32 %v1706_v18, %v1702_v17 }
 0x486   :  { %v1806_v60 = vld [vmem:[#allocation6 + $0x10] sm:$0xff] }
 0x487   :  { %2037 = vrcp.f32 %v1806_v60 }
 0x488   :  { %v1136_v3 = vpop.permute.xlu0 %1135 }
 0x489   :  { %v1138_v4 = vmul.f32 %v1136_v3, %v1132_v2 }
 0x48a   :  { %v1815_v61 = vld [vmem:[#allocation6 + $0x18] sm:$0xff] }
 0x48b   :  { %2039 = vrcp.f32 %v1815_v61 }
 0x48c   :  { %v1516_v12 = vpop.permute.xlu0 %1515 }
 0x48d   :  { %v2036_v62 = vpop.eup %2035  ;;  %v1518_v16 = vmul.f32 %v1516_v12, %v1512_v11 }
 0x48e   :  { %1802 = vperm.xlu0 %2015, %v2036_v62  }
 0x491   :  { %v2038_v63 = vpop.eup %2037 }
 0x492   :  { %1811 = vperm.xlu1 %2016, %v2038_v63  }
 0x495   :  { %v2040_v0 = vpop.eup %2039 }
 0x496   :  { %1820 = vperm.xlu0 %2015, %v2040_v0  }
 0x4b9   :  { %v1794_v26 = vpop.permute.xlu1 %1793 }
 0x4bb   :  { %v1211_v7 = vpop.f32.mrb[2].mxu1 }
 0x4bc   :  { %v1215_v8 = vadd.f32 %v1211_v7, %v1138_v4  ;;  %v1943_v9 = vpop.f32.mrb[3].mxu1 }
 0x4be   :  { %1216 = vst.msk [vmem:[#allocation4] sm:$0xff] %vm133_vm2, %v1215_v8 }
 0x4bf   :  { %v1401_v13 = vpop.f32.mrb[4].mxu1 }
 0x4c0   :  { %v1405_v14 = vadd.f32 %v1401_v13, %v1328_v10  ;;  %v1953_v15 = vpop.f32.mrb[5].mxu1 }
 0x4c2   :  { %1406 = vst.msk [vmem:[#allocation4 + $0x8] sm:$0xff] %vm133_vm2, %v1405_v14 }
 0x4c3   :  { %v1591_v19 = vpop.f32.mrb[6].mxu1 }
 0x4c4   :  { %v1595_v20 = vadd.f32 %v1591_v19, %v1518_v16  ;;  %v1963_v21 = vpop.f32.mrb[7].mxu1 }
 0x4c5   :  { %v1790_v36 = vld [vmem:[#allocation4] sm:$0xff] }
 0x4c6   :  { %1596 = vst.msk [vmem:[#allocation4 + $0x10] sm:$0xff] %vm133_vm2, %v1595_v20  ;;  %v1796_v1 = vmul.f32 %v1794_v26, %v1790_v36 }
 0x4c7   :  { %v1781_v23 = vpop.f32.mrb[8].mxu1 }
 0x4c8   :  { %v1785_v24 = vadd.f32 %v1781_v23, %v1708_v22  ;;  %v1973_v25 = vpop.f32.mrb[9].mxu1 }
 0x4c9   :  { %v1799_v28 = vld [vmem:[#allocation4 + $0x8] sm:$0xff] }
 0x4ca   :  { %1786 = vst.msk [vmem:[#allocation4 + $0x18] sm:$0xff] %vm133_vm2, %v1785_v24 }
 0x4cd   :  { %v1808_v30 = vld [vmem:[#allocation4 + $0x10] sm:$0xff] }
 0x4d1   :  { %v1817_v34 = vld [vmem:[#allocation4 + $0x18] sm:$0xff] }
 0x50d   :  { %v1803_v27 = vpop.permute.xlu0 %1802 }
 0x50e   :  { %v1805_v29 = vmul.f32 %v1803_v27, %v1799_v28 }
 0x510   :  { %1825 = vrot.lane.b32.xlu1 %v1805_v29, %s2116_s7 }
 0x511   :  { %v1812_v31 = vpop.permute.xlu1 %1811 }
 0x512   :  { %v1814_v32 = vmul.f32 %v1812_v31, %v1808_v30 }
 0x514   :  { %1829 = vrot.lane.b32.xlu0 %v1814_v32, %s2129_s17 }
 0x515   :  { %v1821_v33 = vpop.permute.xlu0 %1820 }
 0x516   :  { %v1823_v35 = vmul.f32 %v1821_v33, %v1817_v34 }
 0x518   :  { %1833 = vrot.lane.b32.xlu1 %v1823_v35, %s2130_s18 }
 0x582   :  { %v1826_v37 = vpop.permute.xlu1 %1825 }
 0x583   :  { %v1836_v39 = vsel %vm133_vm2, %v1796_v1, %v1826_v37 }
 0x586   :  { %v1830_v38 = vpop.permute.xlu0 %1829 }
 0x587   :  { %v1838_v40 = vsel %vm1837_vm5, %v1836_v39, %v1830_v38 }
 0x58a   :  { %v1834_v41 = vpop.permute.xlu1 %1833 }
 0x58b   :  { %v1840_v42 = vsel %vm1839_vm6, %v1838_v40, %v1834_v41 }
 0x58c   :  { %1841 = vst.msk [vmem:[#allocation12] sm:$0xff] %vm57_vm1, %v1840_v42 }
 0x58d   :  { %2096 = shalt.err (!%p2093_p6)
}
 0x58e   :  { %s2097_s24 = scalar_lea.hbm %s2340_s3, 128 }
 0x58f   :  { %p2098_p7 = scmp.ne.s32.totalorder %s2340_s3, %s2097_s24  ;;  %p2101_p8 = scmp.lt.u32.totalorder %s2097_s24, %s2340_s3 }
 0x591   :  { %p2103_p9 = pnand %p2101_p8, %p2098_p7 }
 0x593   :  { %2106 = shalt.err (!%p2103_p9)
}
 0x594   :  { %1851 = dma.vmem_to_hbm [thread:$0]  %s1849_s20, 128, %s2340_s3, [#allocation9]  }
 0x595   :  { %2111 = dma.done.wait [#allocation9], 128  }
 0x596   :  { %2112 = vsyncadd [#allocation9], 4294967168 }
 0x597   :  { %1855 = vsyncpa [#allocation8], 1 }
 0x598   :  { %1856 = vsyncpa [#allocation11], 1 }
 0x599   :  { %1857 = vsyncpa [#allocation9], 1 }

</bundles_post_ra>
